<compile_context>
chip_gen: v7x
topology: tpu7x:2x2x1
jax: 0.10.0
libtpu: 0.0.40
codegen_flags: <defaults>
</compile_context>

<pallas_src>
import functools
import math

import jax
import jax.numpy as jnp
from jax.experimental import pallas as pl
from jax.experimental.pallas import tpu as pltpu


def _round_up(n, m):
    return (n + m - 1) // m * m


# ----------------------------------------------------------------------------- params


def init_params(key, state_dim, action_dim, hidden_dim, t_dim):
    """PyTorch-style uniform fan-in init.  Weights stored as (in_features, out_features)."""

    def linear(k, fan_in, fan_out):
        kw, kb = jax.random.split(k)
        bound = 1.0 / math.sqrt(fan_in)
        w = jax.random.uniform(kw, (fan_in, fan_out), jnp.float32, -bound, bound)
        b = jax.random.uniform(kb, (fan_out,), jnp.float32, -bound, bound)
        return w, b

    keys = jax.random.split(key, 7)
    p = {}
    p["ws1"], p["bs1"] = linear(keys[0], state_dim, hidden_dim)
    p["ws2"], p["bs2"] = linear(keys[1], hidden_dim, hidden_dim)
    p["wt1"], p["bt1"] = linear(keys[2], t_dim, t_dim * 2)
    p["wt2"], p["bt2"] = linear(keys[3], t_dim * 2, t_dim)
    cat_dim = hidden_dim + action_dim + t_dim
    p["wm1"], p["bm1"] = linear(keys[4], cat_dim, hidden_dim)
    p["wm2"], p["bm2"] = linear(keys[5], hidden_dim, hidden_dim)
    p["wm3"], p["bm3"] = linear(keys[6], hidden_dim, action_dim)
    return p


def pack_params(p, state_dim, action_dim, hidden_dim, t_dim):
    """Fold the 5 Linear layers of the two branches + trunk into 5 block-diagonal /
    reordered weight blocks of uniform lane width W, packed into one contiguous slab
    (plus one bias slab).  All padding is zeros, so the extra lanes stay exactly 0
    through the whole network (mish(0) == 0)."""
    H, T, A, S = hidden_dim, t_dim, action_dim, state_dim
    s_pad = _round_up(S, 8)                      # padded state width in the fused L1 input
    k1 = s_pad + T                               # fused layer-1 input width: [state_pad | sin | cos]
    c1 = H + 2 * T                               # fused layer-1 output width
    W = _round_up(max(c1, H + T + A), 8)         # uniform activation lane width

    # layer 1 (block-diagonal):  [state_pad | temb] -> [state_hidden(H) | time_hidden(2T)]
    w1 = jnp.zeros((k1, W), jnp.float32)
    w1 = w1.at[:S, :H].set(p["ws1"])
    w1 = w1.at[s_pad:s_pad + T, H:H + 2 * T].set(p["wt1"])
    b1 = jnp.zeros((W,), jnp.float32).at[:H].set(p["bs1"]).at[H:H + 2 * T].set(p["bt1"])

    # layer 2 (block-diagonal): -> [processed_state(H) | t(T) | 0...0 (x slot + pad)]
    w2 = jnp.zeros((W, W), jnp.float32)
    w2 = w2.at[:H, :H].set(p["ws2"])
    w2 = w2.at[H:H + 2 * T, H:H + T].set(p["wt2"])
    b2 = jnp.zeros((W,), jnp.float32).at[:H].set(p["bs2"]).at[H:H + T].set(p["bt2"])

    # mid_layer[0]: rows reordered to the in-kernel activation layout [ps | t | x | pad]
    # (original concat order is [x(A), t(T), state_feat(H)])
    wm1 = jnp.zeros((W, W), jnp.float32)
    wm1 = wm1.at[:H, :H].set(p["wm1"][A + T:, :])            # state_feat rows
    wm1 = wm1.at[H:H + T, :H].set(p["wm1"][A:A + T, :])      # t rows
    wm1 = wm1.at[H + T:H + T + A, :H].set(p["wm1"][:A, :])   # x rows
    bm1 = jnp.zeros((W,), jnp.float32).at[:H].set(p["bm1"])

    wm2 = jnp.zeros((W, W), jnp.float32).at[:H, :H].set(p["wm2"])
    bm2 = jnp.zeros((W,), jnp.float32).at[:H].set(p["bm2"])

    wm3 = jnp.zeros((W, W), jnp.float32).at[:H, :A].set(p["wm3"])
    bm3 = jnp.zeros((W,), jnp.float32).at[:A].set(p["bm3"])

    # single contiguous weight slab; every section starts at an 8-aligned row
    o1 = 0
    o2 = _round_up(o1 + k1, 8)
    o3 = o2 + W
    o4 = o3 + W
    o5 = o4 + W
    rows = o5 + W
    wpack = jnp.zeros((rows, W), jnp.float32)
    wpack = wpack.at[o1:o1 + k1].set(w1)
    wpack = wpack.at[o2:o2 + W].set(w2)
    wpack = wpack.at[o3:o3 + W].set(wm1)
    wpack = wpack.at[o4:o4 + W].set(wm2)
    wpack = wpack.at[o5:o5 + W].set(wm3)

    bpack = jnp.zeros((8, W), jnp.float32)
    bpack = bpack.at[0].set(b1).at[1].set(b2).at[2].set(bm1).at[3].set(bm2).at[4].set(bm3)

    cfg = dict(state_dim=S, action_dim=A, hidden_dim=H, t_dim=T,
               s_pad=s_pad, k1=k1, width=W, w_offsets=(o1, o2, o3, o4, o5))
    return wpack, bpack, cfg


# ----------------------------------------------------------------------------- kernel


def _make_kernel(cfg):
    s_pad, t_dim, k1 = cfg["s_pad"], cfg["t_dim"], cfg["k1"]
    a_dim, W = cfg["action_dim"], cfg["width"]
    o1, o2, o3, o4, o5 = cfg["w_offsets"]
    half = t_dim // 2
    neg_scale = -math.log(10000.0) / (half - 1)

    def mish(v):
        # mish(x) = x * tanh(softplus(x)) = x * ((1+e^x)^2 - 1) / ((1+e^x)^2 + 1)
        # single exp + approximate EUP reciprocal; clamp keeps exp finite (factor -> 1).
        e = jnp.exp(jnp.minimum(v, 20.0))
        q = (1.0 + e) * (1.0 + e)
        return v * (q - 1.0) * pl.reciprocal(q + 1.0, approx=True)

    def kernel(time_ref, state_ref, x_ref, w_ref, b_ref, out_ref):
        f32 = jnp.float32
        # ---- sinusoidal time embedding, generated directly in the fused layer-1
        #      input layout [state_pad(s_pad) | sin(half) | cos(half)] -- no concat.
        lane = jax.lax.broadcasted_iota(jnp.int32, (1, k1), 1)
        fidx = jnp.maximum(jnp.where(lane < s_pad + half, lane - s_pad, lane - s_pad - half), 0)
        freqs = jnp.exp(fidx.astype(f32) * neg_scale)
        arg = time_ref[...] * freqs                                 # (TB,1)*(1,k1) -> (TB,k1)
        sincos = jnp.where(lane < s_pad + half, jnp.sin(arg), jnp.cos(arg))
        in1 = jnp.where(lane < s_pad, state_ref[...], sincos)

        # ---- fused chain: 5 MXU dots total (state/time branches are block-diagonal,
        #      the concat before mid_layer is a single add into pre-zeroed lanes).
        h = mish(jnp.dot(in1, w_ref[o1:o1 + k1, :], preferred_element_type=f32) + b_ref[0:1, :])
        h = jnp.dot(h, w_ref[o2:o2 + W, :], preferred_element_type=f32) + b_ref[1:2, :]
        h = h + x_ref[...]   # x pre-placed host-side in the (exactly zero) x-slot lanes
        h = mish(jnp.dot(h, w_ref[o3:o3 + W, :], preferred_element_type=f32) + b_ref[2:3, :])
        h = mish(jnp.dot(h, w_ref[o4:o4 + W, :], preferred_element_type=f32) + b_ref[3:4, :])
        y = jnp.dot(h, w_ref[o5:o5 + W, :], preferred_element_type=f32) + b_ref[4:5, :]
        out_ref[...] = y[:, :a_dim]

    return kernel


def mlp_forward(x, time, state, wpack, bpack, cfg, block_b=64):
    B = x.shape[0]
    A, H, T, S = cfg["action_dim"], cfg["hidden_dim"], cfg["t_dim"], cfg["state_dim"]
    W, k1 = cfg["width"], cfg["k1"]

    tb = min(block_b, _round_up(B, 8))
    Bp = _round_up(B, tb)

    # Host-side layout plumbing only (zero-padding / lane placement), no compute hoisted.
    t_col = jnp.zeros((Bp, 1), jnp.float32).at[:B, 0].set(time.astype(jnp.float32))
    st = jnp.zeros((Bp, k1), jnp.float32).at[:B, :S].set(state)
    xw = jnp.zeros((Bp, W), jnp.float32).at[:B, H + T:H + T + A].set(x)

    flops = 2 * Bp * W * (k1 + 4 * W)
    transcendentals = Bp * (2 * k1 + 8 * W)
    bytes_accessed = 4 * (Bp * (1 + k1 + W + A) + wpack.size + bpack.size)

    out = pl.pallas_call(
        _make_kernel(cfg),
        out_shape=jax.ShapeDtypeStruct((Bp, A), jnp.float32),
        grid=(Bp // tb,),
        in_specs=[
            pl.BlockSpec((tb, 1), lambda i: (i, 0)),
            pl.BlockSpec((tb, k1), lambda i: (i, 0)),
            pl.BlockSpec((tb, W), lambda i: (i, 0)),
            # parameters: same block every grid step -> DMA'd once, VMEM-resident
            pl.BlockSpec(wpack.shape, lambda i: (0, 0)),
            pl.BlockSpec(bpack.shape, lambda i: (0, 0)),
        ],
        out_specs=pl.BlockSpec((tb, A), lambda i: (i, 0)),
        compiler_params=pltpu.CompilerParams(dimension_semantics=("parallel",)),
        cost_estimate=pl.CostEstimate(flops=flops, transcendentals=transcendentals,
                                      bytes_accessed=bytes_accessed),
    )(t_col, st, xw, wpack, bpack)
    return out[:B]


# -------------------------------------------------------------------------- reference


def reference_forward(x, time, state, p, t_dim):
    def mish(v):
        return v * jnp.tanh(jnp.maximum(v, 0.0) + jnp.log1p(jnp.exp(-jnp.abs(v))))

    half = t_dim // 2
    scale = math.log(10000.0) / (half - 1)
    freqs = jnp.exp(jnp.arange(half, dtype=jnp.float32) * -scale)
    arg = time.astype(jnp.float32)[:, None] * freqs[None, :]
    temb = jnp.concatenate([jnp.sin(arg), jnp.cos(arg)], axis=-1)

    ps = mish(state @ p["ws1"] + p["bs1"]) @ p["ws2"] + p["bs2"]
    t = mish(temb @ p["wt1"] + p["bt1"]) @ p["wt2"] + p["bt2"]
    cat = jnp.concatenate([x, t, ps], axis=1)
    m = mish(cat @ p["wm1"] + p["bm1"])
    m = mish(m @ p["wm2"] + p["bm2"])
    return m @ p["wm3"] + p["bm3"]


# -------------------------------------------------------------------------------- main


if __name__ == "__main__":
    state_dim, action_dim, hidden_dim, t_dim = 6, 3, 32, 16
    batch = 128

    key = jax.random.PRNGKey(0)
    k_param, k_x, k_s, k_t = jax.random.split(key, 4)

    params = init_params(k_param, state_dim, action_dim, hidden_dim, t_dim)
    wpack, bpack, cfg = pack_params(params, state_dim, action_dim, hidden_dim, t_dim)

    x = jax.random.normal(k_x, (batch, action_dim), jnp.float32)
    state = jax.random.normal(k_s, (batch, state_dim), jnp.float32)
    time = jax.random.uniform(k_t, (batch,), jnp.float32, 0.0, 100.0)

    fwd = jax.jit(functools.partial(mlp_forward, cfg=cfg))
    out = jax.block_until_ready(fwd(x, time, state, wpack, bpack))

    ref = reference_forward(x, time, state, params, t_dim)
    assert out.shape == (batch, action_dim)
    # Tolerance accounts for the approximate EUP reciprocal inside mish (the only
    # intentional deviation); observed error is typically well below 1e-2.
    assert jnp.allclose(out, ref, atol=2e-2, rtol=2e-2), (
        f"mismatch vs reference, max abs err = {jnp.max(jnp.abs(out - ref))}")

    print("KERNEL_OK")
</pallas_src>

<mosaic_0001>
module attributes {stable_mosaic.version = 11 : i64} {
  func.func @kernel(%arg0: i32, %arg1: memref<64x1xf32, #tpu.memory_space<vmem>>, %arg2: memref<64x24xf32, #tpu.memory_space<vmem>>, %arg3: memref<64x64xf32, #tpu.memory_space<vmem>>, %arg4: memref<280x64xf32, #tpu.memory_space<vmem>>, %arg5: memref<8x64xf32, #tpu.memory_space<vmem>>, %arg6: memref<64x3xf32, #tpu.memory_space<vmem>>) attributes {dimension_semantics = [#tpu.dimension_semantics<parallel>], iteration_bounds = array<i64: 2>, scalar_prefetch = 0 : i64, scratch_operands = 0 : i64, tpu.core_type = #tpu.core_type<tc>, window_params = [{transform_indices = @transform_0, window_bounds = array<i64: 64, 1>}, {transform_indices = @transform_1, window_bounds = array<i64: 64, 24>}, {transform_indices = @transform_2, window_bounds = array<i64: 64, 64>}, {pipeline_mode = #tpu.pipeline_mode<synchronous>, transform_indices = @transform_3, window_bounds = array<i64: 280, 64>}, {pipeline_mode = #tpu.pipeline_mode<synchronous>, transform_indices = @transform_4, window_bounds = array<i64: 8, 64>}, {transform_indices = @transform_5, window_bounds = array<i64: 64, 3>}]} {
    %0 = tpu.iota {dimensions = array<i32: 1>} : vector<1x24xi32>
    %c16_i32 = arith.constant 16 : i32
    %1 = vector.broadcast %c16_i32 : i32 to vector<1x24xi32>
    %2 = arith.cmpi slt, %0, %1 : vector<1x24xi32>
    %c8_i32 = arith.constant 8 : i32
    %3 = vector.broadcast %c8_i32 : i32 to vector<1x24xi32>
    %4 = arith.subi %0, %3 : vector<1x24xi32>
    %c8_i32_0 = arith.constant 8 : i32
    %5 = vector.broadcast %c8_i32_0 : i32 to vector<1x24xi32>
    %6 = arith.subi %0, %5 : vector<1x24xi32>
    %c8_i32_1 = arith.constant 8 : i32
    %7 = vector.broadcast %c8_i32_1 : i32 to vector<1x24xi32>
    %8 = arith.subi %6, %7 : vector<1x24xi32>
    %9 = arith.select %2, %4, %8 : vector<1x24xi1>, vector<1x24xi32>
    %c0_i32 = arith.constant 0 : i32
    %10 = vector.broadcast %c0_i32 : i32 to vector<1x24xi32>
    %11 = arith.maxsi %9, %10 : vector<1x24xi32>
    %12 = arith.sitofp %11 : vector<1x24xi32> to vector<1x24xf32>
    %cst = arith.constant -1.31576288 : f32
    %13 = vector.broadcast %cst : f32 to vector<1x24xf32>
    %14 = arith.mulf %12, %13 : vector<1x24xf32>
    %15 = math.exp %14 : vector<1x24xf32>
    %c0 = arith.constant 0 : index
    %c0_2 = arith.constant 0 : index
    %16 = vector.load %arg1[%c0, %c0_2] : memref<64x1xf32, #tpu.memory_space<vmem>>, vector<64x1xf32>
    %17 = vector.broadcast %16 : vector<64x1xf32> to vector<64x24xf32>
    %18 = vector.broadcast %15 : vector<1x24xf32> to vector<64x24xf32>
    %19 = arith.mulf %17, %18 : vector<64x24xf32>
    %c16_i32_3 = arith.constant 16 : i32
    %20 = vector.broadcast %c16_i32_3 : i32 to vector<1x24xi32>
    %21 = arith.cmpi slt, %0, %20 : vector<1x24xi32>
    %22 = math.sin %19 : vector<64x24xf32>
    %23 = math.cos %19 : vector<64x24xf32>
    %24 = vector.shape_cast %21 : vector<1x24xi1> to vector<1x24xi1>
    %25 = vector.broadcast %24 : vector<1x24xi1> to vector<64x24xi1>
    %26 = arith.select %25, %22, %23 : vector<64x24xi1>, vector<64x24xf32>
    %c8_i32_4 = arith.constant 8 : i32
    %27 = vector.broadcast %c8_i32_4 : i32 to vector<1x24xi32>
    %28 = arith.cmpi slt, %0, %27 : vector<1x24xi32>
    %c0_5 = arith.constant 0 : index
    %c0_6 = arith.constant 0 : index
    %29 = vector.load %arg2[%c0_5, %c0_6] : memref<64x24xf32, #tpu.memory_space<vmem>>, vector<64x24xf32>
    %30 = vector.shape_cast %28 : vector<1x24xi1> to vector<1x24xi1>
    %31 = vector.broadcast %30 : vector<1x24xi1> to vector<64x24xi1>
    %32 = arith.select %31, %29, %26 : vector<64x24xi1>, vector<64x24xf32>
    %c0_7 = arith.constant 0 : index
    %c0_8 = arith.constant 0 : index
    %33 = vector.load %arg4[%c0_7, %c0_8] : memref<280x64xf32, #tpu.memory_space<vmem>>, vector<24x64xf32>
    %cst_9 = arith.constant dense<0.000000e+00> : vector<64x64xf32>
    %34 = tpu.matmul %32, %33, %cst_9 {dimension_numbers = #tpu.dot_dimension_numbers<[1], [0], [0], [1], [0, 0, 1, 1], [], []>} : vector<64x24xf32>, vector<24x64xf32>, vector<64x64xf32> -> vector<64x64xf32>
    %c0_10 = arith.constant 0 : index
    %c0_11 = arith.constant 0 : index
    %35 = vector.load %arg5[%c0_10, %c0_11] : memref<8x64xf32, #tpu.memory_space<vmem>>, vector<1x64xf32>
    %36 = vector.broadcast %35 : vector<1x64xf32> to vector<64x64xf32>
    %37 = arith.addf %34, %36 : vector<64x64xf32>
    %cst_12 = arith.constant 2.000000e+01 : f32
    %38 = vector.broadcast %cst_12 : f32 to vector<64x64xf32>
    %39 = arith.minimumf %37, %38 : vector<64x64xf32>
    %40 = math.exp %39 : vector<64x64xf32>
    %cst_13 = arith.constant 1.000000e+00 : f32
    %41 = vector.broadcast %cst_13 : f32 to vector<64x64xf32>
    %42 = arith.addf %41, %40 : vector<64x64xf32>
    %cst_14 = arith.constant 1.000000e+00 : f32
    %43 = vector.broadcast %cst_14 : f32 to vector<64x64xf32>
    %44 = arith.addf %43, %40 : vector<64x64xf32>
    %45 = arith.mulf %42, %44 : vector<64x64xf32>
    %cst_15 = arith.constant 1.000000e+00 : f32
    %46 = vector.broadcast %cst_15 : f32 to vector<64x64xf32>
    %47 = arith.subf %45, %46 : vector<64x64xf32>
    %48 = arith.mulf %37, %47 : vector<64x64xf32>
    %cst_16 = arith.constant 1.000000e+00 : f32
    %49 = vector.broadcast %cst_16 : f32 to vector<64x64xf32>
    %50 = arith.addf %45, %49 : vector<64x64xf32>
    %51 = tpu.reciprocal %50 {approx = true} : vector<64x64xf32> -> vector<64x64xf32>
    %52 = arith.mulf %48, %51 : vector<64x64xf32>
    %c24 = arith.constant 24 : index
    %c0_17 = arith.constant 0 : index
    %53 = vector.load %arg4[%c24, %c0_17] : memref<280x64xf32, #tpu.memory_space<vmem>>, vector<64x64xf32>
    %cst_18 = arith.constant dense<0.000000e+00> : vector<64x64xf32>
    %54 = tpu.matmul %52, %53, %cst_18 {dimension_numbers = #tpu.dot_dimension_numbers<[1], [0], [0], [1], [0, 0, 1, 1], [], []>} : vector<64x64xf32>, vector<64x64xf32>, vector<64x64xf32> -> vector<64x64xf32>
    %c1 = arith.constant 1 : index
    %c0_19 = arith.constant 0 : index
    %55 = vector.load %arg5[%c1, %c0_19] : memref<8x64xf32, #tpu.memory_space<vmem>>, vector<1x64xf32>
    %56 = vector.broadcast %55 : vector<1x64xf32> to vector<64x64xf32>
    %57 = arith.addf %54, %56 : vector<64x64xf32>
    %c0_20 = arith.constant 0 : index
    %c0_21 = arith.constant 0 : index
    %58 = vector.load %arg3[%c0_20, %c0_21] : memref<64x64xf32, #tpu.memory_space<vmem>>, vector<64x64xf32>
    %59 = arith.addf %57, %58 : vector<64x64xf32>
    %c88 = arith.constant 88 : index
    %c0_22 = arith.constant 0 : index
    %60 = vector.load %arg4[%c88, %c0_22] : memref<280x64xf32, #tpu.memory_space<vmem>>, vector<64x64xf32>
    %cst_23 = arith.constant dense<0.000000e+00> : vector<64x64xf32>
    %61 = tpu.matmul %59, %60, %cst_23 {dimension_numbers = #tpu.dot_dimension_numbers<[1], [0], [0], [1], [0, 0, 1, 1], [], []>} : vector<64x64xf32>, vector<64x64xf32>, vector<64x64xf32> -> vector<64x64xf32>
    %c2 = arith.constant 2 : index
    %c0_24 = arith.constant 0 : index
    %62 = vector.load %arg5[%c2, %c0_24] : memref<8x64xf32, #tpu.memory_space<vmem>>, vector<1x64xf32>
    %63 = vector.broadcast %62 : vector<1x64xf32> to vector<64x64xf32>
    %64 = arith.addf %61, %63 : vector<64x64xf32>
    %cst_25 = arith.constant 2.000000e+01 : f32
    %65 = vector.broadcast %cst_25 : f32 to vector<64x64xf32>
    %66 = arith.minimumf %64, %65 : vector<64x64xf32>
    %67 = math.exp %66 : vector<64x64xf32>
    %cst_26 = arith.constant 1.000000e+00 : f32
    %68 = vector.broadcast %cst_26 : f32 to vector<64x64xf32>
    %69 = arith.addf %68, %67 : vector<64x64xf32>
    %cst_27 = arith.constant 1.000000e+00 : f32
    %70 = vector.broadcast %cst_27 : f32 to vector<64x64xf32>
    %71 = arith.addf %70, %67 : vector<64x64xf32>
    %72 = arith.mulf %69, %71 : vector<64x64xf32>
    %cst_28 = arith.constant 1.000000e+00 : f32
    %73 = vector.broadcast %cst_28 : f32 to vector<64x64xf32>
    %74 = arith.subf %72, %73 : vector<64x64xf32>
    %75 = arith.mulf %64, %74 : vector<64x64xf32>
    %cst_29 = arith.constant 1.000000e+00 : f32
    %76 = vector.broadcast %cst_29 : f32 to vector<64x64xf32>
    %77 = arith.addf %72, %76 : vector<64x64xf32>
    %78 = tpu.reciprocal %77 {approx = true} : vector<64x64xf32> -> vector<64x64xf32>
    %79 = arith.mulf %75, %78 : vector<64x64xf32>
    %c152 = arith.constant 152 : index
    %c0_30 = arith.constant 0 : index
    %80 = vector.load %arg4[%c152, %c0_30] : memref<280x64xf32, #tpu.memory_space<vmem>>, vector<64x64xf32>
    %cst_31 = arith.constant dense<0.000000e+00> : vector<64x64xf32>
    %81 = tpu.matmul %79, %80, %cst_31 {dimension_numbers = #tpu.dot_dimension_numbers<[1], [0], [0], [1], [0, 0, 1, 1], [], []>} : vector<64x64xf32>, vector<64x64xf32>, vector<64x64xf32> -> vector<64x64xf32>
    %c3 = arith.constant 3 : index
    %c0_32 = arith.constant 0 : index
    %82 = vector.load %arg5[%c3, %c0_32] : memref<8x64xf32, #tpu.memory_space<vmem>>, vector<1x64xf32>
    %83 = vector.broadcast %82 : vector<1x64xf32> to vector<64x64xf32>
    %84 = arith.addf %81, %83 : vector<64x64xf32>
    %cst_33 = arith.constant 2.000000e+01 : f32
    %85 = vector.broadcast %cst_33 : f32 to vector<64x64xf32>
    %86 = arith.minimumf %84, %85 : vector<64x64xf32>
    %87 = math.exp %86 : vector<64x64xf32>
    %cst_34 = arith.constant 1.000000e+00 : f32
    %88 = vector.broadcast %cst_34 : f32 to vector<64x64xf32>
    %89 = arith.addf %88, %87 : vector<64x64xf32>
    %cst_35 = arith.constant 1.000000e+00 : f32
    %90 = vector.broadcast %cst_35 : f32 to vector<64x64xf32>
    %91 = arith.addf %90, %87 : vector<64x64xf32>
    %92 = arith.mulf %89, %91 : vector<64x64xf32>
    %cst_36 = arith.constant 1.000000e+00 : f32
    %93 = vector.broadcast %cst_36 : f32 to vector<64x64xf32>
    %94 = arith.subf %92, %93 : vector<64x64xf32>
    %95 = arith.mulf %84, %94 : vector<64x64xf32>
    %cst_37 = arith.constant 1.000000e+00 : f32
    %96 = vector.broadcast %cst_37 : f32 to vector<64x64xf32>
    %97 = arith.addf %92, %96 : vector<64x64xf32>
    %98 = tpu.reciprocal %97 {approx = true} : vector<64x64xf32> -> vector<64x64xf32>
    %99 = arith.mulf %95, %98 : vector<64x64xf32>
    %c216 = arith.constant 216 : index
    %c0_38 = arith.constant 0 : index
    %100 = vector.load %arg4[%c216, %c0_38] : memref<280x64xf32, #tpu.memory_space<vmem>>, vector<64x64xf32>
    %cst_39 = arith.constant dense<0.000000e+00> : vector<64x64xf32>
    %101 = tpu.matmul %99, %100, %cst_39 {dimension_numbers = #tpu.dot_dimension_numbers<[1], [0], [0], [1], [0, 0, 1, 1], [], []>} : vector<64x64xf32>, vector<64x64xf32>, vector<64x64xf32> -> vector<64x64xf32>
    %c4 = arith.constant 4 : index
    %c0_40 = arith.constant 0 : index
    %102 = vector.load %arg5[%c4, %c0_40] : memref<8x64xf32, #tpu.memory_space<vmem>>, vector<1x64xf32>
    %103 = vector.broadcast %102 : vector<1x64xf32> to vector<64x64xf32>
    %104 = arith.addf %101, %103 : vector<64x64xf32>
    %105 = vector.extract_strided_slice %104 {offsets = [0, 0], sizes = [64, 3], strides = [1, 1]} : vector<64x64xf32> to vector<64x3xf32>
    %c0_41 = arith.constant 0 : index
    %c0_42 = arith.constant 0 : index
    %106 = vector.load %arg6[%c0_41, %c0_42] : memref<64x3xf32, #tpu.memory_space<vmem>>, vector<64x3xf32>
    tpu.vector_store %arg6[%c0_41, %c0_42], %105 {strides = array<i32>} : memref<64x3xf32, #tpu.memory_space<vmem>>, vector<64x3xf32>,
    return
  }
  func.func @transform_0(%arg0: i32) -> (i32, i32) {
    %c0_i32 = arith.constant 0 : i32
    %c0_i32_0 = arith.constant 0 : i32
    return %arg0, %c0_i32 : i32, i32
  }
  func.func @transform_1(%arg0: i32) -> (i32, i32) {
    %c0_i32 = arith.constant 0 : i32
    %c0_i32_0 = arith.constant 0 : i32
    return %arg0, %c0_i32 : i32, i32
  }
  func.func @transform_2(%arg0: i32) -> (i32, i32) {
    %c0_i32 = arith.constant 0 : i32
    %c0_i32_0 = arith.constant 0 : i32
    return %arg0, %c0_i32 : i32, i32
  }
  func.func @transform_3(%arg0: i32) -> (i32, i32) {
    %c0_i32 = arith.constant 0 : i32
    %c0_i32_0 = arith.constant 0 : i32
    %c0_i32_1 = arith.constant 0 : i32
    return %c0_i32, %c0_i32_0 : i32, i32
  }
  func.func @transform_4(%arg0: i32) -> (i32, i32) {
    %c0_i32 = arith.constant 0 : i32
    %c0_i32_0 = arith.constant 0 : i32
    %c0_i32_1 = arith.constant 0 : i32
    return %c0_i32, %c0_i32_0 : i32, i32
  }
  func.func @transform_5(%arg0: i32) -> (i32, i32) {
    %c0_i32 = arith.constant 0 : i32
    %c0_i32_0 = arith.constant 0 : i32
    return %arg0, %c0_i32 : i32, i32
  }
}

</mosaic_0001>

<bundles_post_ra>
// kernel: mlp_forward.1
= control target key start
LH: loop header
LB: loop body
LE: loop exit
PB: predicated region body
PF: predicated region fallthrough
CT: control target
= control target key end

     0   :  { %s3726_s18 = smov 0   ;;  %s4786_s0 = inlined_call_operand.vmem [shape: f32[128,1], index: 0, kind: input, shape index: {}]   ;;  %s4787_s1 = inlined_call_operand.vmem [shape: f32[128,24], index: 1, kind: input, shape index: {}]   ;;  %s4788_s2 = inlined_call_operand.vmem [shape: f32[128,64], index: 2, kind: input, shape index: {}]   ;;  %s4789_s3 = inlined_call_operand.vmem [shape: f32[280,64], index: 3, kind: input, shape index: {}]   ;;  %s4790_s4 = inlined_call_operand.vmem [shape: f32[8,64], index: 4, kind: input, shape index: {}]   ;;  %s4791_s5 = inlined_call_operand.vmem [shape: f32[128,3], index: 5, kind: output, shape index: {}]  }
   0x1 LB: > { %s3077_s19 = sadd.s32 4294967295, %s3687_s18   ;;  %p3081_p0 = scmp.ge.s32.totalorder %s3687_s18, 1  ;;  %s3687_s18 = sphi %s3726_s18, %s15_s18  }
   0x2   : > { %p210_p1 = scmp.lt.s32.totalorder %s3687_s18, 3 }
   0x4   : > { %p211_p2 = pnand %p3081_p0, %p210_p1 }
   0x5   : > { %s3082_s20 = sshll.u32 (!%p211_p2), %s3077_s19, 3  ;;  %v3689_v0 = vmov (!%p211_p2), 0   ;;  %v272_v9 = vlaneseq (!%p211_p2)  ;;  %v3690_v56 = vmov (!%p211_p2), 683565275   ;;  %v3691_v58 = vmov (!%p211_p2), 2475754826  }
   0x6   : > { %214 = sbr.rel (%p211_p2) target bundleno = 1558 (0x616), region = 40  ;;  %3550 = vset.pattern.permute.xlu1 (!%p211_p2), %v3689_v0  ;;  %3549 = vset.pattern.permute.xlu0 (!%p211_p2), %v3689_v0  ;;  %p249_p3 = scmp.lt.s32.totalorder (!%p211_p2), %s3082_s20, 15  ;;  %v3692_v60 = vmov (!%p211_p2), 2131351028   ;;  %v3693_v62 = vmov (!%p211_p2), 2102212464  }
   0x7   : > { %v3740_v10 = vand.u32 (!%p211_p2), 127, %v272_v9  ;;  %v3694_v0 = vmov (!%p211_p2), 920167782   ;;  %v3695_v9 = vmov (!%p211_p2), 1326507024  }
   0x9   : > { %v3090_v11 = vadd.s32 (!%p211_p2), 4294967288, %v3740_v10  ;;  %vm274_vm0 = vcmp.lt.s32.totalorder (!%p211_p2), %v3740_v10, 16 }
   0xb   : > { %v3091_v12 = vadd.s32 (!%p211_p2), 4294967288, %v3090_v11 }
   0xd   : > { %s4807_s20 = smov (!%p249_p3, %s3082_s20), 15  ;;  %v277_v13 = vsel %vm274_vm0, %v3090_v11, %v3091_v12 }
   0xe   : > { %s3734_s21 = sshll.u32 %s4807_s20, 3  ;;  %v3092_v14 = vcvt.s32.f32 %v277_v13  ;;  %vm278_vm1 = vcmp.gt.s32.totalorder %v277_v13, 0 }
   0xf   : > { %s252_s24 = scalar_lea.vmem %s4786_s0, %s3734_s21  ;;  %s4352_s8 = scalar_lea.vmem %s4787_s1, %s3734_s21 }
  0x10   : > { %v286_v1 = vld [vmem:[%s252_s24 + $0x10] sm:$0xff]  ;;  %v284_v2 = vld [vmem:[%s252_s24] sm:$0xff]  ;;  %v287_v3 = vld [vmem:[%s252_s24 + $0x18] sm:$0xff]  ;;  %v3093_v15 = vsel %vm278_vm1, %v3092_v14, 0.0  ;;  %s270_s20 = scalar_lea.vmem %s4791_s5, %s3734_s21 }
  0x11   : > { %304 = vperm.xlu1 %3550, %v286_v1   ;;  %294 = vperm.xlu0 %3549, %v284_v2   ;;  %v285_v4 = vld [vmem:[%s252_s24 + $0x8] sm:$0xff]  ;;  %v288_v6 = vld [vmem:[%s252_s24 + $0x20] sm:$0xff]  ;;  %v291_v7 = vld [vmem:[%s252_s24 + $0x38] sm:$0xff]  ;;  %v281_v16 = vmul.f32 -1.3157629, %v3093_v15 }
  0x12   : > { %v289_v5 = vld [vmem:[%s252_s24 + $0x28] sm:$0xff]  ;;  %v290_v8 = vld [vmem:[%s252_s24 + $0x30] sm:$0xff]  ;;  %s4633_s24 = scalar_lea.vmem %s4788_s2, %s3734_s21 }
  0x13   : > { %v282_v17 = vmul.f32 1.442695, %v281_v16 }
  0x15   : > { %309 = vperm.xlu1 %3550, %v287_v3   ;;  %299 = vperm.xlu0 %3549, %v285_v4   ;;  %3551 = vpow2.f32 %v282_v17 }
  0x19   : > { %319 = vperm.xlu1 %3550, %v289_v5   ;;  %314 = vperm.xlu0 %3549, %v288_v6  }
  0x1d   : > { %329 = vperm.xlu1 %3550, %v291_v7   ;;  %324 = vperm.xlu0 %3549, %v290_v8  }
  0x1f   : > { %v3746_v18 = vpop.eup %3551 }
  0x90   : > { %v305_v19 = vpop.permute.xlu1 %304  ;;  %v295_v20 = vpop.permute.xlu0 %294 }
  0x91   : > { %v3749_v21 = vmul.f32 %v3746_v18, %v305_v19  ;;  %v3752_v22 = vmul.f32 %v3746_v18, %v295_v20 }
  0x93   : > { %v548_v23 = vand.u32 2147483647, %v3749_v21  ;;  %v551_v24 = vand.u32 2139095040, %v3749_v21  ;;  %v340_v25 = vand.u32 2147483647, %v3752_v22  ;;  %v343_v26 = vand.u32 2139095040, %v3752_v22 }
  0x94   : > { %v310_v27 = vpop.permute.xlu1 %309  ;;  %v300_v33 = vpop.permute.xlu0 %299 }
  0x95   : > { %v552_v28 = vshrl.u32 %v551_v24, 23  ;;  %v555_v29 = vand.u32 8388607, %v548_v23  ;;  %v3761_v30 = vmul.f32 %v3746_v18, %v310_v27  ;;  %v344_v31 = vshrl.u32 %v343_v26, 23 }
  0x96   : > { %v347_v32 = vand.u32 8388607, %v340_v25  ;;  %v3768_v40 = vmul.f32 %v3746_v18, %v300_v33 }
  0x97   : > { %v3102_v34 = vadd.s32 4294967169, %v552_v28  ;;  %v652_v35 = vand.u32 2147483647, %v3761_v30  ;;  %v3094_v36 = vadd.s32 4294967169, %v344_v31  ;;  %v655_v37 = vand.u32 2139095040, %v3761_v30 }
  0x98   : > { %v556_v38 = vor.u32 8388608, %v555_v29  ;;  %v348_v41 = vor.u32 8388608, %v347_v32  ;;  %v444_v50 = vand.u32 2147483647, %v3768_v40 }
  0x99   : > { %v558_v39 = vadd.s32 1, %v3102_v34  ;;  %v350_v42 = vadd.s32 1, %v3094_v36  ;;  %v656_v43 = vshrl.u32 %v655_v37, 23  ;;  %v3772_v44 = vand.u32 8388607, %v652_v35 }
  0x9a   : > { %v3774_v48 = vshll.u32 %v556_v38, 8  ;;  %v3779_v53 = vshll.u32 %v348_v41, 8 }
  0x9b   : > { %vm559_vm2 = vcmp.gt.s32.totalorder %v558_v39, 0  ;;  %vm351_vm3 = vcmp.gt.s32.totalorder %v350_v42, 0  ;;  %v3106_v46 = vadd.s32 4294967169, %v656_v43  ;;  %v660_v54 = vor.u32 8388608, %v3772_v44 }
  0x9c   : > { %v560_v45 = vsel %vm559_vm2, %v558_v39, 0  ;;  %v352_v49 = vsel %vm351_vm3, %v350_v42, 0 }
  0x9d   : > { %v562_v47 = vand.u32 31, %v560_v45  ;;  %v561_v51 = vshrl.u32 %v560_v45, 5  ;;  %v3777_v52 = vand.u32 31, %v352_v49  ;;  %v3787_v2 = vshrl.u32 %v352_v49, 5 }
  0x9e   : > { %v3789_v3 = vadd.s32 1, %v3106_v46 }
  0x9f   : > { %v563_v55 = vsub.s32 32, %v562_v47  ;;  %v565_v57 = vshll.u32 %v3690_v56, %v562_v47  ;;  %v568_v59 = vshll.u32 %v3691_v58, %v562_v47  ;;  %v571_v61 = vshll.u32 %v3692_v60, %v562_v47 }
  0xa0   : > { %v574_v63 = vshll.u32 %v3693_v62, %v562_v47  ;;  %v577_v1 = vshll.u32 %v3694_v0, %v562_v47  ;;  %vm580_vm4 = vcmp.lt.s32.totalorder %v561_v51, 1  ;;  %vm581_vm5 = vcmp.lt.s32.totalorder %v561_v51, 2 }
  0xa1   : > { %v564_v4 = vshrl.u32 %v3690_v56, %v563_v55  ;;  %v566_v5 = vshrl.u32 %v3691_v58, %v563_v55  ;;  %v569_v6 = vshrl.u32 %v3692_v60, %v563_v55  ;;  %v572_v7 = vshrl.u32 %v3693_v62, %v563_v55 }
  0xa2   : > { %v575_v8 = vshrl.u32 %v3694_v0, %v563_v55  ;;  %v578_v11 = vshrl.u32 %v3695_v9, %v563_v55  ;;  %v355_v15 = vsub.s32 32, %v3777_v52  ;;  %vm582_vm6 = vcmp.lt.s32.totalorder %v561_v51, 3 }
  0xa3   : > { %v567_v12 = vor.u32 %v566_v5, %v565_v57  ;;  %v570_v13 = vor.u32 %v569_v6, %v568_v59  ;;  %v573_v14 = vor.u32 %v572_v7, %v571_v61  ;;  %vm583_vm7 = vcmp.lt.s32.totalorder %v561_v51, 4 }
  0xa4   : > { %v576_v16 = vor.u32 %v575_v8, %v574_v63  ;;  %v579_v17 = vor.u32 %v578_v11, %v577_v1  ;;  %v357_v31 = vshll.u32 %v3690_v56, %v3777_v52  ;;  %v358_v34 = vshrl.u32 %v3691_v58, %v355_v15 }
  0xa5   : > { %v584_v19 = vsel %vm580_vm4, %v564_v4, %v567_v12  ;;  %v585_v20 = vsel %vm583_vm7, %v573_v14, 2102212464  ;;  %v588_v24 = vsel %vm580_vm4, %v567_v12, %v570_v13  ;;  %v592_v26 = vsel %vm580_vm4, %v570_v13, %v573_v14 }
  0xa6   : > { %v586_v27 = vsel %vm582_vm6, %v570_v13, %v585_v20  ;;  %v589_v28 = vsel %vm583_vm7, %v576_v16, 920167782  ;;  %v593_v29 = vsel %vm583_vm7, %v579_v17, 1326507024  ;;  %v360_v36 = vshll.u32 %v3691_v58, %v3777_v52 }
  0xa7   : > { %v590_v32 = vsel %vm582_vm6, %v573_v14, %v589_v28  ;;  %v594_v33 = vsel %vm582_vm6, %v576_v16, %v593_v29  ;;  %v587_v37 = vsel %vm581_vm5, %v584_v19, %v586_v27  ;;  %v361_v41 = vshrl.u32 %v3692_v60, %v355_v15 }
  0xa8   : > { %v591_v38 = vsel %vm581_vm5, %v588_v24, %v590_v32  ;;  %v595_v39 = vsel %vm581_vm5, %v592_v26, %v594_v33  ;;  %v359_v47 = vor.u32 %v358_v34, %v357_v31  ;;  %v363_v55 = vshll.u32 %v3692_v60, %v3777_v52 }
  0xa9   : > { %v3808_v42 = vmul.u32.u64.low %v3774_v48, %v595_v39  ;;  %v3809_v43 = vmul.u32.u64.high %v3774_v48, %v595_v39, %v3808_v42  ;;  %v3812_v45 = vmul.u32.u64.low %v3774_v48, %v591_v38  ;;  %v3813_v46 = vmul.u32.u64.high %v3774_v48, %v591_v38, %v3812_v45 }
  0xaa   : > { %v362_v49 = vor.u32 %v361_v41, %v360_v36  ;;  %v364_v57 = vshrl.u32 %v3693_v62, %v355_v15  ;;  %v356_v51 = vshrl.u32 %v3690_v56, %v355_v15  ;;  %v366_v59 = vshll.u32 %v3693_v62, %v3777_v52 }
  0xab   : > { %v367_v61 = vshrl.u32 %v3694_v0, %v355_v15  ;;  %v370_v63 = vshrl.u32 %v3695_v9, %v355_v15  ;;  %v603_v1 = vmul.u32 %v3774_v48, %v587_v37  ;;  %v369_v5 = vshll.u32 %v3694_v0, %v3777_v52 }
  0xac   : > { %v365_v4 = vor.u32 %v364_v57, %v363_v55  ;;  %vm372_vm8 = vcmp.lt.s32.totalorder %v3787_v2, 1  ;;  %vm605_vm9 = vc.u32 %v3809_v43, %v3812_v45  ;;  %v606_v6 = vadd.s32 1, %v3813_v46 }
  0xad   : > { %v368_v7 = vor.u32 %v367_v61, %v366_v59  ;;  %vm373_vm10 = vcmp.lt.s32.totalorder %v3787_v2, 2  ;;  %v371_v8 = vor.u32 %v370_v63, %v369_v5  ;;  %vm374_vm11 = vcmp.lt.s32.totalorder %v3787_v2, 3 }
  0xae   : > { %vm375_vm12 = vcmp.lt.s32.totalorder %v3787_v2, 4  ;;  %v380_v48 = vsel %vm372_vm8, %v359_v47, %v362_v49  ;;  %v607_v11 = vsel %vm605_vm9, %v606_v6, %v3813_v46  ;;  %v384_v13 = vsel %vm372_vm8, %v362_v49, %v365_v4 }
  0xaf   : > { %v377_v12 = vsel %vm375_vm12, %v365_v4, 2102212464  ;;  %v381_v52 = vsel %vm375_vm12, %v368_v7, 920167782  ;;  %v608_v14 = vadd.s32 %v607_v11, %v603_v1  ;;  %v376_v15 = vsel %vm372_vm8, %v356_v51, %v359_v47 }
  0xb0   : > { %v382_v16 = vsel %vm374_vm11, %v365_v4, %v381_v52  ;;  %v385_v17 = vsel %vm375_vm12, %v371_v8, 1326507024  ;;  %v378_v19 = vsel %vm374_vm11, %v362_v49, %v377_v12  ;;  %vm663_vm13 = vcmp.gt.s32.totalorder %v3789_v3, 0 }
  0xb1   : > { %v383_v20 = vsel %vm373_vm10, %v380_v48, %v382_v16  ;;  %v386_v24 = vsel %vm374_vm11, %v368_v7, %v385_v17  ;;  %v609_v26 = vadd.s32 536870912, %v608_v14  ;;  %v664_v33 = vsel %vm663_vm13, %v3789_v3, 0 }
  0xb2   : > { %v387_v27 = vsel %vm373_vm10, %v384_v13, %v386_v24  ;;  %v3841_v28 = vmul.u32.u64.low %v3779_v53, %v383_v20  ;;  %v3842_v29 = vmul.u32.u64.high %v3779_v53, %v383_v20, %v3841_v28  ;;  %v447_v34 = vand.u32 2139095040, %v3768_v40 }
  0xb3   : > { %v3846_v31 = vmul.u32.u64.low %v3779_v53, %v387_v27  ;;  %v3847_v32 = vmul.u32.u64.high %v3779_v53, %v387_v27, %v3846_v31  ;;  %v3851_v36 = vshrl.u32 %v609_v26, 30  ;;  %v379_v37 = vsel %vm373_vm10, %v376_v15, %v378_v19 }
  0xb4   : > { %v666_v38 = vand.u32 31, %v664_v33  ;;  %v398_v41 = vadd.s32 1, %v3842_v29  ;;  %v3859_v46 = vand.u32 8388607, %v444_v50  ;;  %v395_v47 = vmul.u32 %v3779_v53, %v379_v37 }
  0xb5   : > { %v611_v39 = vshll.u32 %v3851_v36, 30  ;;  %vm397_vm14 = vc.u32 %v3847_v32, %v3841_v28  ;;  %v3866_v3 = vshll.u32 %v660_v54, 8  ;;  %v448_v2 = vshrl.u32 %v447_v34, 23 }
  0xb6   : > { %v667_v42 = vsub.s32 32, %v666_v38  ;;  %v399_v55 = vsel %vm397_vm14, %v398_v41, %v3842_v29  ;;  %v3869_v57 = vshrl.u32 %v664_v33, 5  ;;  %v669_v51 = vshll.u32 %v3690_v56, %v666_v38 }
  0xb7   : > { %v612_v49 = vsub.s32 %v608_v14, %v611_v39  ;;  %v400_v59 = vadd.s32 %v399_v55, %v395_v47  ;;  %v672_v53 = vshll.u32 %v3691_v58, %v666_v38  ;;  %v675_v44 = vshll.u32 %v3692_v60, %v666_v38 }
  0xb8   : > { %v670_v61 = vshrl.u32 %v3691_v58, %v667_v42  ;;  %v673_v63 = vshrl.u32 %v3692_v60, %v667_v42  ;;  %v676_v54 = vshrl.u32 %v3693_v62, %v667_v42  ;;  %v678_v4 = vshll.u32 %v3693_v62, %v666_v38 }
  0xb9   : > { %v614_v1 = vsub.s32 0, %v612_v49  ;;  %v401_v5 = vadd.s32 536870912, %v400_v59  ;;  %v679_v8 = vshrl.u32 %v3694_v0, %v667_v42  ;;  %v681_v12 = vshll.u32 %v3694_v0, %v666_v38 }
  0xba   : > { %v671_v6 = vor.u32 %v670_v61, %v669_v51  ;;  %v674_v7 = vor.u32 %v673_v63, %v672_v53  ;;  %v677_v11 = vor.u32 %v676_v54, %v675_v44  ;;  %v682_v52 = vshrl.u32 %v3695_v9, %v667_v42 }
  0xbb   : > { %v3103_v48 = vmin.u32 %v614_v1, %v612_v49  ;;  %v604_v13 = vadd.s32 %v3812_v45, %v3809_v43  ;;  %v3883_v14 = vshrl.u32 %v401_v5, 30  ;;  %v680_v15 = vor.u32 %v679_v8, %v678_v4 }
  0xbc   : > { %v3098_v16 = vadd.s32 4294967169, %v448_v2  ;;  %v668_v19 = vshrl.u32 %v3690_v56, %v667_v42  ;;  %v683_v20 = vor.u32 %v682_v52, %v681_v12  ;;  %vm684_vm15 = vcmp.lt.s32.totalorder %v3869_v57, 1  ;;  %v320_v12 = vpop.permute.xlu1 %319 }
  0xbd   : > { %v616_v17 = vclz %v3103_v48  ;;  %v403_v24 = vshll.u32 %v3883_v14, 30  ;;  %vm685_vm1 = vcmp.lt.s32.totalorder %v3869_v57, 2  ;;  %vm687_vm2 = vcmp.lt.s32.totalorder %v3869_v57, 4 }
  0xbe   : > { %v692_v26 = vsel %vm684_vm15, %v671_v6, %v674_v7  ;;  %vm686_vm3 = vcmp.lt.s32.totalorder %v3869_v57, 3  ;;  %v693_v43 = vsel %vm687_vm2, %v680_v15, 920167782  ;;  %v696_v45 = vsel %vm684_vm15, %v674_v7, %v677_v11  ;;  %v315_v57 = vpop.permute.xlu0 %314 }
  0xbf   : > { %v3104_v27 = vadd.s32 4294967294, %v616_v17  ;;  %v3891_v29 = vsub.s32 %v400_v59, %v403_v24  ;;  %v689_v31 = vsel %vm687_vm2, %v677_v11, 2102212464  ;;  %v694_v33 = vsel %vm686_vm3, %v677_v11, %v693_v43 }
  0xc0   : > { %v697_v34 = vsel %vm687_vm2, %v683_v20, 1326507024  ;;  %v688_v37 = vsel %vm684_vm15, %v668_v19, %v671_v6  ;;  %v695_v38 = vsel %vm685_vm1, %v692_v26, %v694_v33  ;;  %v454_v2 = vadd.s32 1, %v3098_v16 }
  0xc1   : > { %vm3105_vm4 = vcmp.lt.s32.totalorder %v3104_v27, 0  ;;  %v698_v39 = vsel %vm686_vm3, %v680_v15, %v697_v34  ;;  %v406_v42 = vsub.s32 0, %v3891_v29  ;;  %v690_v61 = vsel %vm686_vm3, %v674_v7, %v689_v31 }
  0xc2   : > { %v619_v41 = vsel %vm3105_vm4, 0, %v3104_v27  ;;  %v699_v47 = vsel %vm685_vm1, %v696_v45, %v698_v39  ;;  %vm455_vm5 = vcmp.gt.s32.totalorder %v454_v2, 0  ;;  %v691_v7 = vsel %vm685_vm1, %v688_v37, %v690_v61 }
  0xc3   : > { %v620_v55 = vsub.s32 32, %v619_v41  ;;  %v621_v51 = vshll.u32 %v612_v49, %v619_v41  ;;  %v624_v59 = vsub.s32 4294967266, %v619_v41  ;;  %v3095_v53 = vmin.u32 %v406_v42, %v3891_v29 }
  0xc4   : > { %v3906_v63 = vmul.u32.u64.low %v3866_v3, %v699_v47  ;;  %v3907_v1 = vmul.u32.u64.high %v3866_v3, %v699_v47, %v3906_v63  ;;  %v3910_v4 = vmul.u32.u64.low %v3866_v3, %v695_v38  ;;  %v3911_v5 = vmul.u32.u64.high %v3866_v3, %v695_v38, %v3910_v4 }
  0xc5   : > { %v622_v44 = vshrl.u32 %v604_v13, %v620_v55  ;;  %v625_v54 = vadd.s32 127, %v624_v59  ;;  %v408_v6 = vclz %v3095_v53  ;;  %v456_v49 = vsel %vm455_vm5, %v454_v2, 0 }
  0xc6   : > { %v458_v11 = vand.u32 31, %v456_v49  ;;  %vm709_vm6 = vc.u32 %v3907_v1, %v3910_v4  ;;  %v710_v15 = vadd.s32 1, %v3911_v5  ;;  %v452_v16 = vor.u32 8388608, %v3859_v46 }
  0xc7   : > { %v623_v8 = vor.u32 %v622_v44, %v621_v51  ;;  %v626_v48 = vshll.u32 %v625_v54, 23  ;;  %v3096_v52 = vadd.s32 4294967294, %v408_v6  ;;  %v707_v19 = vmul.u32 %v3866_v3, %v691_v7 }
  0xc8   : > { %v3922_v20 = vmul.f32 %v3746_v18, %v320_v12  ;;  %v711_v27 = vsel %vm709_vm6, %v710_v15, %v3911_v5  ;;  %v459_v43 = vsub.s32 32, %v458_v11  ;;  %vm550_vm8 = vcmp.lt.s32.totalorder %v3749_v21, 0 }
  0xc9   : > { %v627_v13 = vor.u32 4788187, %v626_v48  ;;  %v630_v17 = vcvt.s32.f32 %v623_v8  ;;  %vm3097_vm7 = vcmp.lt.s32.totalorder %v3096_v52, 0  ;;  %v396_v45 = vadd.s32 %v3841_v28, %v3847_v32 }
  0xca   : > { %v411_v26 = vsel %vm3097_vm7, 0, %v3096_v52  ;;  %v712_v33 = vadd.s32 %v711_v27, %v707_v19  ;;  %v634_v3 = vsub.s32 4, %v3851_v36  ;;  %v3929_v37 = vshll.u32 %v452_v16, 8 }
  0xcb   : > { %v628_v24 = vand.u32 2147483647, %v627_v13  ;;  %v412_v31 = vsub.s32 32, %v411_v26  ;;  %v416_v46 = vsub.s32 4294967266, %v411_v26  ;;  %v3932_v38 = vmul.f32 %v3746_v18, %v315_v57 }
  0xcc   : > { %v413_v39 = vshll.u32 %v3891_v29, %v411_v26  ;;  %v713_v47 = vadd.s32 536870912, %v712_v33  ;;  %v461_v2 = vshll.u32 %v3690_v56, %v458_v11  ;;  %v462_v28 = vshrl.u32 %v3691_v58, %v459_v43 }
  0xcd   : > { %v631_v34 = vmul.f32 %v630_v17, %v628_v24  ;;  %v414_v41 = vshrl.u32 %v396_v45, %v412_v31  ;;  %v417_v42 = vadd.s32 127, %v416_v46  ;;  %v465_v32 = vshrl.u32 %v3692_v60, %v459_v43 }
  0xce   : > { %v468_v55 = vshrl.u32 %v3693_v62, %v459_v43  ;;  %vm3941_vm9 = vcmp.le.f32.partialorder %v548_v23, 0.7853982  ;;  %v3945_v29 = vshrl.u32 %v713_v47, 30  ;;  %v471_v53 = vshrl.u32 %v3694_v0, %v459_v43 }
  0xcf   : > { %v415_v59 = vor.u32 %v414_v41, %v413_v39  ;;  %v418_v61 = vshll.u32 %v417_v42, 23  ;;  %v632_v63 = vxor.u32 2147483648, %v631_v34  ;;  %v464_v44 = vshll.u32 %v3691_v58, %v458_v11 }
  0xd0   : > { %v470_v54 = vshll.u32 %v3693_v62, %v458_v11  ;;  %v474_v5 = vshrl.u32 %v3695_v9, %v459_v43  ;;  %v715_v8 = vshll.u32 %v3945_v29, 30  ;;  %v457_v23 = vshrl.u32 %v456_v49, 5 }
  0xd1   : > { %v419_v6 = vor.u32 4788187, %v418_v61  ;;  %v467_v48 = vshll.u32 %v3692_v60, %v458_v11  ;;  %v463_v7 = vor.u32 %v462_v28, %v461_v2  ;;  %v466_v12 = vor.u32 %v465_v32, %v464_v44 }
  0xd2   : > { %v472_v52 = vor.u32 %v471_v53, %v470_v54  ;;  %v473_v13 = vshll.u32 %v3694_v0, %v458_v11  ;;  %v422_v16 = vcvt.s32.f32 %v415_v59  ;;  %v3954_v17 = vsub.s32 %v712_v33, %v715_v8  ;;  %v330_v59 = vpop.permute.xlu1 %329 }
  0xd3   : > { %v420_v15 = vand.u32 2147483647, %v419_v6  ;;  %v469_v19 = vor.u32 %v468_v55, %v467_v48  ;;  %v633_v57 = vsel %vm550_vm8, %v632_v63, %v631_v34  ;;  %vm342_vm10 = vcmp.lt.s32.totalorder %v3752_v22, 0 }
  0xd4   : > { %v460_v24 = vshrl.u32 %v3690_v56, %v459_v43  ;;  %v475_v49 = vor.u32 %v474_v5, %v473_v13  ;;  %v860_v26 = vand.u32 2147483647, %v3922_v20  ;;  %v718_v45 = vsub.s32 0, %v3954_v17 }
  0xd5   : > { %v423_v27 = vmul.f32 %v422_v16, %v420_v15  ;;  %vm476_vm11 = vcmp.lt.s32.totalorder %v457_v23, 1  ;;  %vm479_vm12 = vcmp.lt.s32.totalorder %v457_v23, 4  ;;  %vm654_vm13 = vcmp.lt.s32.totalorder %v3761_v30, 0 }
  0xd6   : > { %vm477_vm14 = vcmp.lt.s32.totalorder %v457_v23, 2  ;;  %vm478_vm15 = vcmp.lt.s32.totalorder %v457_v23, 3  ;;  %v484_v11 = vsel %vm476_vm11, %v463_v7, %v466_v12  ;;  %v485_v31 = vsel %vm479_vm12, %v472_v52, 920167782 }
  0xd7   : > { %vm3966_vm1 = vcmp.le.f32.partialorder %v340_v25, 0.7853982  ;;  %v3107_v43 = vmin.u32 %v718_v45, %v3954_v17  ;;  %v481_v33 = vsel %vm479_vm12, %v469_v19, 2102212464  ;;  %v486_v34 = vsel %vm478_vm15, %v469_v19, %v485_v31 }
  0xd8   : > { %v488_v39 = vsel %vm476_vm11, %v466_v12, %v469_v19  ;;  %v636_v41 = vsel %vm3941_vm9, %v3749_v21, %v633_v57  ;;  %v487_v42 = vsel %vm477_vm14, %v484_v11, %v486_v34  ;;  %v489_v47 = vsel %vm479_vm12, %v475_v49, 1326507024 }
  0xd9   : > { %v863_v2 = vand.u32 2139095040, %v3922_v20  ;;  %v424_v25 = vxor.u32 2147483648, %v423_v27  ;;  %v720_v28 = vclz %v3107_v43  ;;  %v480_v32 = vsel %vm476_vm11, %v460_v24, %v463_v7 }
  0xda   : > { %v490_v55 = vsel %vm478_vm15, %v472_v52, %v489_v47  ;;  %v482_v61 = vsel %vm478_vm15, %v466_v12, %v481_v33  ;;  %v3983_v63 = vmul.u32.u64.low %v3929_v37, %v487_v42  ;;  %v3984_v44 = vmul.u32.u64.high %v3929_v37, %v487_v42, %v3983_v63 }
  0xdb   : > { %v491_v53 = vsel %vm477_vm14, %v488_v39, %v490_v55  ;;  %v3108_v54 = vadd.s32 4294967294, %v720_v28  ;;  %v738_v5 = vsub.s32 4, %v3945_v29  ;;  %v635_v48 = vsel %vm550_vm8, %v634_v3, %v3851_v36 }
  0xdc   : > { %v3989_v6 = vmul.u32.u64.low %v3929_v37, %v491_v53  ;;  %v3990_v8 = vmul.u32.u64.high %v3929_v37, %v491_v53, %v3989_v6  ;;  %vm3999_vm2 = vcmp.le.f32.partialorder %v652_v35, 0.7853982  ;;  %v708_v12 = vadd.s32 %v3910_v4, %v3907_v1 }
  0xdd   : > { %v864_v52 = vshrl.u32 %v863_v2, 23  ;;  %v4006_v13 = vmul.f32 %v3746_v18, %v330_v59  ;;  %3553 = vcosq.f32 %v636_v41  ;;  %v425_v15 = vsel %vm342_vm10, %v424_v25, %v423_v27 }
  0xde   : > { %vm3109_vm3 = vcmp.lt.s32.totalorder %v3108_v54, 0  ;;  %v483_v36 = vsel %vm477_vm14, %v480_v32, %v482_v61  ;;  %v502_v35 = vadd.s32 1, %v3984_v44  ;;  %v867_v19 = vand.u32 8388607, %v860_v26 }
  0xdf   : > { %v723_v3 = vsel %vm3109_vm3, 0, %v3108_v54  ;;  %v3114_v16 = vadd.s32 4294967169, %v864_v52  ;;  %v739_v4 = vsel %vm654_vm13, %v738_v5, %v3945_v29  ;;  %v759_v24 = vand.u32 2139095040, %v3932_v38 }
  0xe0   : > { %v724_v57 = vsub.s32 32, %v723_v3  ;;  %v728_v1 = vsub.s32 4294967266, %v723_v3  ;;  %v4021_v23 = vsel %vm3966_vm1, %v3752_v22, %v425_v15  ;;  %v499_v49 = vmul.u32 %v3929_v37, %v483_v36 }
  0xe1   : > { %vm501_vm4 = vc.u32 %v3990_v8, %v3983_v63  ;;  %v870_v27 = vadd.s32 1, %v3114_v16  ;;  %v725_v45 = vshll.u32 %v3954_v17, %v723_v3  ;;  %v868_v33 = vor.u32 8388608, %v867_v19 }
  0xe2   : > { %v726_v11 = vshrl.u32 %v708_v12, %v724_v57  ;;  %v729_v31 = vadd.s32 127, %v728_v1  ;;  %v503_v43 = vsel %vm501_vm4, %v502_v35, %v3984_v44  ;;  %v756_v34 = vand.u32 2147483647, %v3932_v38 }
  0xe3   : > { %v504_v29 = vadd.s32 %v503_v43, %v499_v49  ;;  %vm871_vm5 = vcmp.gt.s32.totalorder %v870_v27, 0  ;;  %v760_v2 = vshrl.u32 %v759_v24, 23  ;;  %v4031_v37 = vsel %vm3941_vm9, 0, %v635_v48 }
  0xe4   : > { %v727_v39 = vor.u32 %v726_v11, %v725_v45  ;;  %v730_v42 = vshll.u32 %v729_v31, 23  ;;  %v872_v47 = vsel %vm871_vm5, %v870_v27, 0  ;;  %3555 = vsinq.f32 %v636_v41 }
  0xe5   : > { %v505_v25 = vadd.s32 536870912, %v504_v29  ;;  %v874_v17 = vand.u32 31, %v872_v47  ;;  %3557 = vcosq.f32 %v4021_v23  ;;  %v4036_v32 = vsel %vm3999_vm2, 0, %v739_v4 }
  0xe6   : > { %v731_v28 = vor.u32 4788187, %v730_v42  ;;  %v1068_v55 = vand.u32 2147483647, %v4006_v13  ;;  %v4041_v53 = vshll.u32 %v868_v33, 8  ;;  %v734_v54 = vcvt.s32.f32 %v727_v39 }
  0xe7   : > { %v4039_v59 = vshrl.u32 %v505_v25, 30  ;;  %v875_v61 = vsub.s32 32, %v874_v17  ;;  %v4045_v51 = vand.u32 8388607, %v756_v34  ;;  %v4047_v41 = vpop.eup %3553  ;;  %v873_v5 = vshrl.u32 %v872_v47, 5 }
  0xe8   : > { %v732_v44 = vand.u32 2147483647, %v731_v28  ;;  %v3110_v6 = vadd.s32 4294967169, %v760_v2  ;;  %v877_v12 = vshll.u32 %v3690_v56, %v874_v17  ;;  %v880_v15 = vshll.u32 %v3691_v58, %v874_v17 }
  0xe9   : > { %v507_v48 = vshll.u32 %v4039_v59, 30  ;;  %v878_v52 = vshrl.u32 %v3691_v58, %v875_v61  ;;  %v881_v36 = vshrl.u32 %v3692_v60, %v875_v61  ;;  %v883_v3 = vshll.u32 %v3692_v60, %v874_v17 }
  0xea   : > { %v884_v35 = vshrl.u32 %v3693_v62, %v875_v61  ;;  %v887_v16 = vshrl.u32 %v3694_v0, %v875_v61  ;;  %v735_v19 = vmul.f32 %v734_v54, %v732_v44  ;;  %v886_v1 = vshll.u32 %v3693_v62, %v874_v17 }
  0xeb   : > { %v4057_v57 = vsub.s32 %v504_v29, %v507_v48  ;;  %v890_v4 = vshrl.u32 %v3695_v9, %v875_v61  ;;  %v879_v24 = vor.u32 %v878_v52, %v877_v12  ;;  %v882_v49 = vor.u32 %v881_v36, %v880_v15 }
  0xec   : > { %v885_v27 = vor.u32 %v884_v35, %v883_v3  ;;  %v889_v45 = vshll.u32 %v3694_v0, %v874_v17  ;;  %vm446_vm6 = vcmp.lt.s32.totalorder %v3768_v40, 0  ;;  %v500_v11 = vadd.s32 %v3983_v63, %v3990_v8 }
  0xed   : > { %v510_v31 = vsub.s32 0, %v4057_v57  ;;  %v888_v43 = vor.u32 %v887_v16, %v886_v1  ;;  %v764_v29 = vor.u32 8388608, %v4045_v51  ;;  %v876_v33 = vshrl.u32 %v3690_v56, %v875_v61 }
  0xee   : > { %v891_v39 = vor.u32 %v890_v4, %v889_v45  ;;  %vm895_vm7 = vcmp.lt.s32.totalorder %v873_v5, 4  ;;  %v766_v42 = vadd.s32 1, %v3110_v6  ;;  %v4068_v47 = vpop.eup %3555  ;;  %v736_v2 = vxor.u32 2147483648, %v735_v19 }
  0xef   : > { %v3099_v25 = vmin.u32 %v510_v31, %v4057_v57  ;;  %vm892_vm8 = vcmp.lt.s32.totalorder %v873_v5, 1  ;;  %v897_v17 = vsel %vm895_vm7, %v885_v27, 2102212464  ;;  %v4072_v28 = vpop.eup %3557  ;;  %vm893_vm9 = vcmp.lt.s32.totalorder %v873_v5, 2 }
  0xf0   : > { %vm894_vm11 = vcmp.lt.s32.totalorder %v873_v5, 3  ;;  %v900_v63 = vsel %vm892_vm8, %v879_v24, %v882_v49  ;;  %v901_v8 = vsel %vm895_vm7, %v888_v43, 920167782  ;;  %v896_v61 = vsel %vm892_vm8, %v876_v33, %v879_v24 }
  0xf1   : > { %v512_v51 = vclz %v3099_v25  ;;  %v898_v44 = vsel %vm894_vm11, %v882_v49, %v897_v17  ;;  %v902_v54 = vsel %vm894_vm11, %v885_v27, %v901_v8  ;;  %v530_v6 = vsub.s32 4, %v4039_v59 }
  0xf2   : > { %v903_v48 = vsel %vm893_vm9, %v900_v63, %v902_v54  ;;  %v904_v12 = vsel %vm892_vm8, %v882_v49, %v885_v27  ;;  %v905_v52 = vsel %vm895_vm7, %v891_v39, 1326507024  ;;  %v737_v16 = vsel %vm654_vm13, %v736_v2, %v735_v19 }
  0xf3   : > { %v3100_v15 = vadd.s32 4294967294, %v512_v51  ;;  %v906_v36 = vsel %vm894_vm11, %v888_v43, %v905_v52  ;;  %v4079_v3 = vmul.u32.u64.low %v4041_v53, %v903_v48  ;;  %v4080_v35 = vmul.u32.u64.high %v4041_v53, %v903_v48, %v4079_v3 }
  0xf4   : > { %v899_v1 = vsel %vm893_vm9, %v896_v61, %v898_v44  ;;  %v907_v4 = vsel %vm893_vm9, %v904_v12, %v906_v36  ;;  %vm767_vm12 = vcmp.gt.s32.totalorder %v766_v42, 0  ;;  %v4094_v31 = vsel %vm446_vm6, %v530_v6, %v4039_v59 }
  0xf5   : > { %vm3101_vm14 = vcmp.lt.s32.totalorder %v3100_v15, 0  ;;  %v4088_v24 = vmul.u32.u64.low %v4041_v53, %v907_v4  ;;  %v4089_v49 = vmul.u32.u64.high %v4041_v53, %v907_v4, %v4088_v24  ;;  %v768_v27 = vsel %vm767_vm12, %v766_v42, 0 }
  0xf6   : > { %v515_v45 = vsel %vm3101_vm14, 0, %v3100_v15  ;;  %v770_v43 = vand.u32 31, %v768_v27  ;;  %v4096_v33 = vshll.u32 %v764_v29, 8  ;;  %v4101_v5 = vsel %vm3999_vm2, %v3761_v30, %v737_v16 }
  0xf7   : > { %v516_v19 = vsub.s32 32, %v515_v45  ;;  %v520_v39 = vsub.s32 4294967266, %v515_v45  ;;  %v918_v2 = vadd.s32 1, %v4080_v35  ;;  %v517_v42 = vshll.u32 %v4057_v57, %v515_v45 }
  0xf8   : > { %v915_v25 = vmul.u32 %v4041_v53, %v899_v1  ;;  %v771_v17 = vsub.s32 32, %v770_v43  ;;  %v1071_v59 = vand.u32 2139095040, %v4006_v13  ;;  %vm917_vm13 = vc.u32 %v4089_v49, %v4079_v3 }
  0xf9   : > { %v518_v63 = vshrl.u32 %v500_v11, %v516_v19  ;;  %v521_v8 = vadd.s32 127, %v520_v39  ;;  %v773_v7 = vshll.u32 %v3690_v56, %v770_v43  ;;  %v919_v29 = vsel %vm917_vm13, %v918_v2, %v4080_v35 }
  0xfa   : > { %v774_v51 = vshrl.u32 %v3691_v58, %v771_v17  ;;  %v777_v61 = vshrl.u32 %v3692_v60, %v771_v17  ;;  %v779_v57 = vshll.u32 %v3692_v60, %v770_v43  ;;  %v920_v54 = vadd.s32 %v919_v29, %v915_v25 }
  0xfb   : > { %v519_v44 = vor.u32 %v518_v63, %v517_v42  ;;  %v522_v53 = vshll.u32 %v521_v8, 23  ;;  %v780_v6 = vshrl.u32 %v3693_v62, %v771_v17  ;;  %v769_v11 = vshrl.u32 %v768_v27, 5 }
  0xfc   : > { %v776_v48 = vshll.u32 %v3691_v58, %v770_v43  ;;  %v782_v12 = vshll.u32 %v3693_v62, %v770_v43  ;;  %v783_v52 = vshrl.u32 %v3694_v0, %v771_v17  ;;  %v921_v36 = vadd.s32 536870912, %v920_v54 }
  0xfd   : > { %v523_v15 = vor.u32 4788187, %v522_v53  ;;  %v775_v35 = vor.u32 %v774_v51, %v773_v7  ;;  %v781_v16 = vor.u32 %v780_v6, %v779_v57  ;;  %vm4120_vm15 = vcmp.le.f32.partialorder %v444_v50, 0.7853982 }
  0xfe   : > { %v778_v4 = vor.u32 %v777_v61, %v776_v48  ;;  %v784_v24 = vor.u32 %v783_v52, %v782_v12  ;;  %v785_v27 = vshll.u32 %v3694_v0, %v770_v43  ;;  %v786_v45 = vshrl.u32 %v3695_v9, %v771_v17 }
  0xff   : > { %v524_v19 = vand.u32 2147483647, %v523_v15  ;;  %v526_v39 = vcvt.s32.f32 %v519_v44  ;;  %vm862_vm2 = vcmp.lt.s32.totalorder %v3922_v20, 0  ;;  %v922_v2 = vshrl.u32 %v921_v36, 30 }
 0x100   : > { %v4129_v42 = vand.u32 8388607, %v1068_v55  ;;  %v772_v50 = vshrl.u32 %v3690_v56, %v771_v17  ;;  %v787_v25 = vor.u32 %v786_v45, %v785_v27  ;;  %vm791_vm3 = vcmp.lt.s32.totalorder %v769_v11, 4 }
 0x101   : > { %v1072_v63 = vshrl.u32 %v1071_v59, 23  ;;  %v527_v8 = vmul.f32 %v526_v39, %v524_v19  ;;  %v923_v7 = vshll.u32 %v922_v2, 30  ;;  %vm788_vm4 = vcmp.lt.s32.totalorder %v769_v11, 1 }
 0x102   : > { %v793_v43 = vsel %vm791_vm3, %v781_v16, 2102212464  ;;  %vm4134_vm5 = vcmp.le.f32.partialorder %v860_v26, 0.7853982  ;;  %v796_v51 = vsel %vm788_vm4, %v775_v35, %v778_v4  ;;  %v797_v61 = vsel %vm791_vm3, %v784_v24, 920167782 }
 0x103   : > { %v800_v57 = vsel %vm788_vm4, %v778_v4, %v781_v16  ;;  %v801_v44 = vsel %vm791_vm3, %v787_v25, 1326507024  ;;  %v4138_v53 = vsub.s32 %v920_v54, %v923_v7  ;;  %vm789_vm7 = vcmp.lt.s32.totalorder %v769_v11, 2 }
 0x104   : > { %vm790_vm8 = vcmp.lt.s32.totalorder %v769_v11, 3  ;;  %v792_v17 = vsel %vm788_vm4, %v772_v50, %v775_v35  ;;  %v946_v59 = vsub.s32 4, %v922_v2  ;;  %v528_v52 = vxor.u32 2147483648, %v527_v8  ;;  %v2025_v35 = vld [vmem:[%s4789_s3] sm:$0xff]  ;;  %v2027_v11 = vld [vmem:[%s4789_s3 + $0x10] sm:$0xff] }
 0x105   : > { %v794_v6 = vsel %vm790_vm8, %v778_v4, %v793_v43  ;;  %v798_v48 = vsel %vm790_vm8, %v781_v16, %v797_v61  ;;  %v802_v12 = vsel %vm790_vm8, %v784_v24, %v801_v44  ;;  %v926_v15 = vsub.s32 0, %v4138_v53  ;;  %v2026_v16 = vld [vmem:[%s4789_s3 + $0x8] sm:$0xff]  ;;  %v325_v43 = vpop.permute.xlu0 %324 }
 0x106   : > { %v799_v26 = vsel %vm789_vm7, %v796_v51, %v798_v48  ;;  %v803_v36 = vsel %vm789_vm7, %v800_v57, %v802_v12  ;;  %3559 = vsinq.f32 %v4021_v23  ;;  %v3122_v45 = vadd.s32 4294967169, %v1072_v63 }
 0x107   : > { %v4145_v27 = vmul.u32.u64.low %v4096_v33, %v803_v36  ;;  %v4146_v54 = vmul.u32.u64.high %v4096_v33, %v803_v36, %v4145_v27  ;;  %v4157_v4 = vsel %vm4120_vm15, 0, %v4094_v31  ;;  %v3115_v23 = vmin.u32 %v926_v15, %v4138_v53 }
 0x108   : > { %v4161_v24 = vmul.u32.u64.low %v4096_v33, %v799_v26  ;;  %v4162_v19 = vmul.u32.u64.high %v4096_v33, %v799_v26, %v4161_v24  ;;  %3561 = vcosq.f32 %v4101_v5  ;;  %v947_v39 = vsel %vm862_vm2, %v946_v59, %v922_v2 }
 0x109   : > { %v795_v50 = vsel %vm789_vm7, %v792_v17, %v794_v6  ;;  %v1078_v25 = vadd.s32 1, %v3122_v45  ;;  %v529_v63 = vsel %vm446_vm6, %v528_v52, %v527_v8  ;;  %v928_v31 = vclz %v3115_v23 }
 0x10a   : > { %v1076_v7 = vor.u32 8388608, %v4129_v42  ;;  %v3434_v51 = vpack.c.bf16 %v2026_v16, %v2025_v35  ;;  %3563 = vsinq.f32 %v4101_v5  ;;  %v916_v61 = vadd.s32 %v4079_v3, %v4089_v49 }
 0x10b   : > { %vm813_vm9 = vc.u32 %v4146_v54, %v4161_v24  ;;  %vm1079_vm11 = vcmp.gt.s32.totalorder %v1078_v25, 0  ;;  %v3116_v2 = vadd.s32 4294967294, %v928_v31  ;;  %v4182_v8 = vsel %vm4134_vm5, 0, %v947_v39 }
 0x10c   : > { %v814_v42 = vadd.s32 1, %v4162_v19  ;;  %v1080_v57 = vsel %vm1079_vm11, %v1078_v25, 0  ;;  %3435 = vmatprep.subr.bf16.mxu0 %v3434_v51  ;;  %v4188_v3 = vsel %vm4120_vm15, %v3768_v40, %v529_v63  ;;  %v811_v49 = vmul.u32 %v4096_v33, %v795_v50 }
 0x10d   : > { %v1082_v5 = vand.u32 31, %v1080_v57  ;;  %v4192_v44 = vmul.f32 %v3746_v18, %v325_v43  ;;  %3437 = vmatpush3.bf16.msra.mxu0 %v3434_v51  ;;  %vm3117_vm6 = vcmp.lt.s32.totalorder %v3116_v2, 0  ;;  %v4195_v59 = vshll.u32 %v1076_v7, 8 }
 0x10e   : > { %v815_v17 = vsel %vm813_vm9, %v814_v42, %v4162_v19  ;;  %v426_v6 = vsub.s32 4, %v3883_v14  ;;  %3308 = vmatprep.subr.mxu0 %v2027_v11  ;;  %v931_v48 = vsel %vm3117_vm6, 0, %v3116_v2  ;;  %vm758_vm12 = vcmp.lt.s32.totalorder %v3932_v38, 0 }
 0x10f   : > { %v816_v1 = vadd.s32 %v815_v17, %v811_v49  ;;  %v4199_v12 = vshrl.u32 %v1080_v57, 5  ;;  %v1083_v33 = vsub.s32 32, %v1082_v5  ;;  %v932_v52 = vsub.s32 32, %v931_v48 }
 0x110   : > { %v933_v18 = vshll.u32 %v4138_v53, %v931_v48  ;;  %v936_v15 = vsub.s32 4294967266, %v931_v48  ;;  %v1085_v26 = vshll.u32 %v3690_v56, %v1082_v5  ;;  %v4203_v36 = vpop.eup %3559  ;;  %v1088_v35 = vshll.u32 %v3691_v58, %v1082_v5 }
 0x111   : > { %v817_v27 = vadd.s32 536870912, %v816_v1  ;;  %v1086_v45 = vshrl.u32 %v3691_v58, %v1083_v33  ;;  %v1089_v16 = vshrl.u32 %v3692_v60, %v1083_v33  ;;  %3309 = vmatpush3.msra.mxu0 %v2027_v11  ;;  %v934_v23 = vshrl.u32 %v916_v61, %v932_v52 }
 0x112   : > { %v937_v19 = vadd.s32 127, %v936_v15  ;;  %v1091_v39 = vshll.u32 %v3692_v60, %v1082_v5  ;;  %v1092_v50 = vshrl.u32 %v3693_v62, %v1083_v33  ;;  %v4210_v53 = vpop.eup %3561  ;;  %v1094_v7 = vshll.u32 %v3693_v62, %v1082_v5 }
 0x113   : > { %v818_v25 = vshrl.u32 %v817_v27, 30  ;;  %v1087_v63 = vor.u32 %v1086_v45, %v1085_v26  ;;  %v1090_v31 = vor.u32 %v1089_v16, %v1088_v35  ;;  %v935_v43 = vor.u32 %v934_v23, %v933_v18 }
 0x114   : > { %v938_v51 = vshll.u32 %v937_v19, 23  ;;  %v1093_v2 = vor.u32 %v1092_v50, %v1091_v39  ;;  %v1095_v42 = vshrl.u32 %v3694_v0, %v1083_v33  ;;  %v4214_v57 = vpop.eup %3563  ;;  %v1097_v49 = vshll.u32 %v3694_v0, %v1082_v5 }
 0x115   : > { %v819_v61 = vshll.u32 %v818_v25, 30  ;;  %v842_v11 = vsub.s32 4, %v818_v25  ;;  %v1098_v17 = vshrl.u32 %v3695_v9, %v1083_v33  ;;  %v964_v15 = vand.u32 2147483647, %v4192_v44 }
 0x116   : > { %v939_v48 = vor.u32 4788187, %v938_v51  ;;  %v1096_v52 = vor.u32 %v1095_v42, %v1094_v7  ;;  %v967_v26 = vand.u32 2139095040, %v4192_v44  ;;  %v942_v27 = vcvt.s32.f32 %v935_v43 }
 0x117   : > { %vm4222_vm14 = vcmp.le.f32.partialorder %v756_v34, 0.7853982  ;;  %v4226_v45 = vsub.s32 %v816_v1, %v819_v61  ;;  %v1084_v35 = vshrl.u32 %v3690_v56, %v1083_v33  ;;  %v1099_v5 = vor.u32 %v1098_v17, %v1097_v49 }
 0x118   : > { %v940_v16 = vand.u32 2147483647, %v939_v48  ;;  %v843_v23 = vsel %vm758_vm12, %v842_v11, %v818_v25  ;;  %vm1100_vm13 = vcmp.lt.s32.totalorder %v4199_v12, 1  ;;  %vm1103_vm15 = vcmp.lt.s32.totalorder %v4199_v12, 4 }
 0x119   : > { %v822_v19 = vsub.s32 0, %v4226_v45  ;;  %vm1101_vm3 = vcmp.lt.s32.totalorder %v4199_v12, 2  ;;  %v1105_v34 = vsel %vm1103_vm15, %v1093_v2, 2102212464  ;;  %v1108_v39 = vsel %vm1100_vm13, %v1087_v63, %v1090_v31 }
 0x11a   : > { %v943_v50 = vmul.f32 %v942_v27, %v940_v16  ;;  %vm1102_vm4 = vcmp.lt.s32.totalorder %v4199_v12, 3  ;;  %v1109_v1 = vsel %vm1103_vm15, %v1096_v52, 920167782  ;;  %v1112_v33 = vsel %vm1100_vm13, %v1090_v31, %v1093_v2 }
 0x11b   : > { %v3111_v7 = vmin.u32 %v822_v19, %v4226_v45  ;;  %v1104_v43 = vsel %vm1100_vm13, %v1084_v35, %v1087_v63  ;;  %v1110_v51 = vsel %vm1102_vm4, %v1093_v2, %v1109_v1  ;;  %v1113_v25 = vsel %vm1103_vm15, %v1099_v5, 1326507024 }
 0x11c   : > { %v944_v42 = vxor.u32 2147483648, %v943_v50  ;;  %v1106_v61 = vsel %vm1102_vm4, %v1090_v31, %v1105_v34  ;;  %v1111_v11 = vsel %vm1101_vm3, %v1108_v39, %v1110_v51  ;;  %v1114_v49 = vsel %vm1102_vm4, %v1096_v52, %v1113_v25 }
 0x11d   : > { %v824_v17 = vclz %v3111_v7  ;;  %v1115_v48 = vsel %vm1101_vm3, %v1112_v33, %v1114_v49  ;;  %v4242_v27 = vmul.u32.u64.low %v4195_v59, %v1111_v11  ;;  %v4243_v16 = vmul.u32.u64.high %v4195_v59, %v1111_v11, %v4242_v27 }
 0x11e   : > { %v945_v19 = vsel %vm862_vm2, %v944_v42, %v943_v50  ;;  %v4248_v63 = vmul.u32.u64.low %v4195_v59, %v1115_v48  ;;  %v4249_v2 = vmul.u32.u64.high %v4195_v59, %v1115_v48, %v4248_v63  ;;  %v968_v31 = vshrl.u32 %v967_v26, 23 }
 0x11f   : > { %3565 = vcosq.f32 %v4188_v3  ;;  %v3112_v35 = vadd.s32 4294967294, %v824_v17  ;;  %v1107_v52 = vsel %vm1101_vm3, %v1104_v43, %v1106_v61  ;;  %v971_v5 = vand.u32 8388607, %v964_v15 }
 0x120   : > { %3567 = vsinq.f32 %v4188_v3  ;;  %v812_v34 = vadd.s32 %v4161_v24, %v4146_v54  ;;  %v4261_v39 = vsel %vm4222_vm14, 0, %v843_v23  ;;  %v3118_v50 = vadd.s32 4294967169, %v968_v31 }
 0x121   : > { %v948_v26 = vsel %vm4134_vm5, %v3922_v20, %v945_v19  ;;  %vm3113_vm2 = vcmp.lt.s32.totalorder %v3112_v35, 0  ;;  %v1126_v12 = vadd.s32 1, %v4243_v16  ;;  %v427_v3 = vsel %vm342_vm10, %v426_v6, %v3883_v14 }
 0x122   : > { %v827_v1 = vsel %vm3113_vm2, 0, %v3112_v35  ;;  %v1123_v54 = vmul.u32 %v4195_v59, %v1107_v52  ;;  %vm1125_vm7 = vc.u32 %v4249_v2, %v4242_v27  ;;  %v974_v24 = vadd.s32 1, %v3118_v50 }
 0x123   : > { %v828_v23 = vsub.s32 32, %v827_v1  ;;  %v832_v33 = vsub.s32 4294967266, %v827_v1  ;;  %v1127_v29 = vsel %vm1125_vm7, %v1126_v12, %v4243_v16  ;;  %v972_v7 = vor.u32 8388608, %v971_v5 }
 0x124   : > { %3569 = vcosq.f32 %v948_v26  ;;  %v1128_v43 = vadd.s32 %v1127_v29, %v1123_v54  ;;  %vm975_vm5 = vcmp.gt.s32.totalorder %v974_v24, 0  ;;  %v429_v51 = vsel %vm3966_vm1, 0, %v427_v3 }
 0x125   : > { %v829_v25 = vshll.u32 %v4226_v45, %v827_v1  ;;  %v830_v14 = vshrl.u32 %v812_v34, %v828_v23  ;;  %v833_v6 = vadd.s32 127, %v832_v33  ;;  %v976_v42 = vsel %vm975_vm5, %v974_v24, 0 }
 0x126   : > { %3571 = vsinq.f32 %v948_v26  ;;  %v1129_v59 = vadd.s32 536870912, %v1128_v43  ;;  %v978_v61 = vand.u32 31, %v976_v42  ;;  %v437_v11 = vxor.u32 2147483648, %v4203_v36 }
 0x127   : > { %v831_v49 = vor.u32 %v830_v14, %v829_v25  ;;  %v834_v17 = vshll.u32 %v833_v6, 23  ;;  %v4280_v48 = vadd.s32 %v4242_v27, %v4249_v2  ;;  %v4282_v16 = vshll.u32 %v972_v7, 8 }
 0x128   : > { %v4284_v19 = vshrl.u32 %v1129_v59, 30  ;;  %v979_v46 = vsub.s32 32, %v978_v61  ;;  %v433_v63 = vadd.s32 3, %v429_v51  ;;  %v440_v45 = vxor.u32 2147483648, %v4072_v28 }
 0x129   : > { %v4287_v31 = vpop.eup %3565  ;;  %v835_v35 = vor.u32 4788187, %v834_v17  ;;  %v977_v52 = vshrl.u32 %v976_v42, 5  ;;  %v981_v5 = vshll.u32 %v3690_v56, %v978_v61  ;;  %v984_v34 = vshll.u32 %v3691_v58, %v978_v61 }
 0x12a   : > { %v4291_v50 = vpop.eup %3567  ;;  %v838_v27 = vcvt.s32.f32 %v831_v49  ;;  %v1131_v2 = vshll.u32 %v4284_v19, 30  ;;  %v982_v26 = vshrl.u32 %v3691_v58, %v979_v46  ;;  %v987_v12 = vshll.u32 %v3692_v60, %v978_v61 }
 0x12b   : > { %v836_v3 = vand.u32 2147483647, %v835_v35  ;;  %v985_v1 = vshrl.u32 %v3692_v60, %v979_v46  ;;  %v988_v54 = vshrl.u32 %v3693_v62, %v979_v46  ;;  %v991_v24 = vshrl.u32 %v3694_v0, %v979_v46 }
 0x12c   : > { %v4299_v23 = vsub.s32 %v1128_v43, %v1131_v2  ;;  %v990_v33 = vshll.u32 %v3693_v62, %v978_v61  ;;  %v434_v29 = vand.u32 3, %v433_v63  ;;  %v4302_v7 = vand.u32 3, %v429_v51 }
 0x12d   : > { %v839_v25 = vmul.f32 %v838_v27, %v836_v3  ;;  %v983_v14 = vor.u32 %v982_v26, %v981_v5  ;;  %v986_v6 = vor.u32 %v985_v1, %v984_v34  ;;  %v989_v58 = vor.u32 %v988_v54, %v987_v12 }
 0x12e   : > { %v4304_v42 = vpop.eup %3569  ;;  %v1134_v59 = vsub.s32 0, %v4299_v23  ;;  %v992_v60 = vor.u32 %v991_v24, %v990_v33  ;;  %v993_v49 = vshll.u32 %v3694_v0, %v978_v61  ;;  %v994_v17 = vshrl.u32 %v3695_v9, %v979_v46 }
 0x12f   : > { %v840_v43 = vxor.u32 2147483648, %v839_v25  ;;  %v980_v35 = vshrl.u32 %v3690_v56, %v979_v46  ;;  %vm996_vm10 = vcmp.lt.s32.totalorder %v977_v52, 1  ;;  %vm999_vm1 = vcmp.lt.s32.totalorder %v977_v52, 4 }
 0x130   : > { %v4310_v62 = vpop.eup %3571  ;;  %v3123_v51 = vmin.u32 %v1134_v59, %v4299_v23  ;;  %v995_v63 = vor.u32 %v994_v17, %v993_v49  ;;  %vm998_vm8 = vcmp.lt.s32.totalorder %v977_v52, 3  ;;  %v1001_v5 = vsel %vm999_vm1, %v989_v58, 2102212464 }
 0x131   : > { %v1000_v34 = vsel %vm996_vm10, %v980_v35, %v983_v14  ;;  %v1002_v27 = vsel %vm998_vm8, %v986_v6, %v1001_v5  ;;  %v1004_v0 = vsel %vm996_vm10, %v983_v14, %v986_v6  ;;  %v1005_v9 = vsel %vm999_vm1, %v992_v60, 920167782 }
 0x132   : > { %v841_v56 = vsel %vm758_vm12, %v840_v43, %v839_v25  ;;  %v1136_v61 = vclz %v3123_v51  ;;  %vm997_vm9 = vcmp.lt.s32.totalorder %v977_v52, 2  ;;  %v1006_v46 = vsel %vm998_vm8, %v989_v58, %v1005_v9 }
 0x133   : > { %vm432_vm11 = vweird.f32 %v3752_v22  ;;  %v1007_v2 = vsel %vm997_vm9, %v1004_v0, %v1006_v46  ;;  %v1008_v26 = vsel %vm996_vm10, %v986_v6, %v989_v58  ;;  %v1009_v12 = vsel %vm999_vm1, %v995_v63, 1326507024 }
 0x134   : > { %vm1266_vm6 = vcmp.lt.s32.totalorder %v4302_v7, 2  ;;  %vm1267_vm13 = vcmp.eq.s32.totalorder %v4302_v7, 0  ;;  %v3124_v3 = vadd.s32 4294967294, %v1136_v61  ;;  %v1154_v1 = vsub.s32 4, %v4284_v19 }
 0x135   : > { %v1003_v54 = vsel %vm997_vm9, %v1000_v34, %v1002_v27  ;;  %v1010_v24 = vsel %vm998_vm8, %v992_v60, %v1009_v12  ;;  %v844_v33 = vsel %vm4222_vm14, %v3932_v38, %v841_v56  ;;  %vm436_vm15 = vcmp.eq.s32.totalorder %v434_v29, 0  ;;  %v2007_v56 = vld [vmem:[%s4352_s8] sm:$0xff] }
 0x136   : > { %v1011_v25 = vsel %vm997_vm9, %v1008_v26, %v1010_v24  ;;  %v4332_v14 = vmul.u32.u64.low %v4282_v16, %v1007_v2  ;;  %v4333_v6 = vmul.u32.u64.high %v4282_v16, %v1007_v2, %v4332_v14  ;;  %vm3125_vm12 = vcmp.lt.s32.totalorder %v3124_v3, 0 }
 0x137   : > { %v4336_v58 = vmul.u32.u64.low %v4282_v16, %v1011_v25  ;;  %v4337_v59 = vmul.u32.u64.high %v4282_v16, %v1011_v25, %v4336_v58  ;;  %v1139_v49 = vsel %vm3125_vm12, 0, %v3124_v3  ;;  %v1019_v52 = vmul.u32 %v4282_v16, %v1003_v54 }
 0x138   : > { %v438_v18 = vsel %vm436_vm15, %v4072_v28, %v437_v11  ;;  %vm439_vm14 = vcmp.eq.s32.totalorder %v434_v29, 2  ;;  %v1140_v60 = vsub.s32 32, %v1139_v49  ;;  %v1144_v17 = vsub.s32 4294967266, %v1139_v49 }
 0x139   : > { %vm435_vm3 = vcmp.lt.s32.totalorder %v434_v29, 2  ;;  %v441_v43 = vsel %vm439_vm14, %v440_v45, %v4203_v36  ;;  %v1141_v35 = vshll.u32 %v4299_v23, %v1139_v49  ;;  %v1022_v51 = vadd.s32 1, %v4333_v6 }
 0x13a   : > { %v442_v16 = vsel %vm435_vm3, %v438_v18, %v441_v43  ;;  %v1269_v29 = vsel %vm1267_vm13, %v4072_v28, %v437_v11  ;;  %v1142_v63 = vshrl.u32 %v4280_v48, %v1140_v60  ;;  %v1145_v5 = vadd.s32 127, %v1144_v17 }
 0x13b   : > { %vm1021_vm4 = vc.u32 %v4337_v59, %v4332_v14  ;;  %vm1270_vm2 = vcmp.eq.s32.totalorder %v4302_v7, 2  ;;  %v443_v34 = vsel %vm432_vm11, nan, %v442_v16  ;;  %vm2006_vm7 = vcmp.lt.s32.totalorder %v3740_v10, 8  ;;  %v2246_v10 = vld [vmem:[%s4789_s3 + $0x30] sm:$0xff] }
 0x13c   : > { %v1023_v23 = vsel %vm1021_vm4, %v1022_v51, %v4333_v6  ;;  %v1272_v27 = vsel %vm1270_vm2, %v440_v45, %v4203_v36  ;;  %v1143_v0 = vor.u32 %v1142_v63, %v1141_v35  ;;  %v1146_v11 = vshll.u32 %v1145_v5, 23  ;;  %v2008_v63 = vld [vmem:[%s4352_s8 + $0x8] sm:$0xff] }
 0x13d   : > { %v1024_v9 = vadd.s32 %v1023_v23, %v1019_v52  ;;  %v1273_v48 = vsel %vm1266_vm6, %v1269_v29, %v1272_v27  ;;  %3573 = vcosq.f32 %v844_v33  ;;  %vm1070_vm5 = vcmp.lt.s32.totalorder %v4006_v13, 0 }
 0x13e   : > { %v1274_v61 = vsel %vm432_vm11, nan, %v1273_v48  ;;  %vm2033_vm10 = vcmask 195584   ;;  %v537_v46 = vadd.s32 3, %v4157_v4  ;;  %vm4378_vm1 = vcmp.le.f32.partialorder %v1068_v55, 0.7853982 }
 0x13f   : > { %v1147_v36 = vor.u32 4788187, %v1146_v11  ;;  %v1025_v45 = vadd.s32 536870912, %v1024_v9  ;;  %v1998_v7 = vsel %vm274_vm0, %v443_v34, %v1274_v61  ;;  %v541_v2 = vxor.u32 2147483648, %v4291_v50 }
 0x140   : > { %v2017_v22 = vsel %vm2006_vm7, %v2007_v56, %v1998_v7  ;;  %v538_v26 = vand.u32 3, %v537_v46  ;;  %v544_v12 = vxor.u32 2147483648, %v4287_v31  ;;  %v1368_v3 = vand.u32 3, %v4157_v4 }
 0x141   : > { %v1148_v54 = vand.u32 2147483647, %v1147_v36  ;;  %v1150_v55 = vcvt.s32.f32 %v1143_v0  ;;  %v4389_v24 = vshrl.u32 %v1025_v45, 30  ;;  %3310 = vmatprep.mubr.msk.f32.mxu0 %vm2033_vm10, %v2017_v22  ;;  %v641_v25 = vadd.s32 3, %v4031_v37 }
 0x142   : > { %3575 = vsinq.f32 %v844_v33  ;;  %v4394_v6 = vadd.s32 %v4332_v14, %v4337_v59  ;;  %vm536_vm8 = vweird.f32 %v3768_v40  ;;  %vm540_vm9 = vcmp.eq.s32.totalorder %v538_v26, 0 }
 0x143   : > { %v1151_v58 = vmul.f32 %v1150_v55, %v1148_v54  ;;  %v1027_v49 = vshll.u32 %v4389_v24, 30  ;;  %v542_v4 = vsel %vm540_vm9, %v4287_v31, %v541_v2  ;;  %vm543_vm11 = vcmp.eq.s32.totalorder %v538_v26, 2 }
 0x144   : > { %vm539_vm6 = vcmp.lt.s32.totalorder %v538_v26, 2  ;;  %v545_v52 = vsel %vm543_vm11, %v544_v12, %v4291_v50  ;;  %vm1370_vm13 = vcmp.eq.s32.totalorder %v1368_v3, 0  ;;  %v642_v18 = vand.u32 3, %v641_v25 }
 0x145   : > { %v1152_v60 = vxor.u32 2147483648, %v1151_v58  ;;  %v4400_v33 = vsub.s32 %v1024_v9, %v1027_v49  ;;  %v546_v14 = vsel %vm539_vm6, %v542_v4, %v545_v52  ;;  %vm1373_vm12 = vcmp.eq.s32.totalorder %v1368_v3, 2 }
 0x146   : > { %vm640_vm15 = vweird.f32 %v3749_v21  ;;  %v547_v59 = vsel %vm536_vm8, nan, %v546_v14  ;;  %vm1369_vm14 = vcmp.lt.s32.totalorder %v1368_v3, 2  ;;  %v1372_v17 = vsel %vm1370_vm13, %v4287_v31, %v541_v2 }
 0x147   : > { %v1375_v43 = vsel %vm1373_vm12, %v544_v12, %v4291_v50  ;;  %v1153_v35 = vsel %vm1070_vm5, %v1152_v60, %v1151_v58  ;;  %v1030_v51 = vsub.s32 0, %v4400_v33  ;;  %v1050_v16 = vsub.s32 4, %v4389_v24  ;;  %v4412_v5 = vpop.eup %3573 }
 0x148   : > { %v1376_v29 = vsel %vm1369_vm14, %v1372_v17, %v1375_v43  ;;  %v1156_v23 = vsel %vm4378_vm1, %v4006_v13, %v1153_v35  ;;  %vm643_vm3 = vcmp.lt.s32.totalorder %v642_v18, 2  ;;  %v645_v50 = vxor.u32 2147483648, %v4068_v47 }
 0x149   : > { %v1377_v31 = vsel %vm536_vm8, nan, %v1376_v29  ;;  %3577 = vcosq.f32 %v1156_v23  ;;  %v3119_v34 = vmin.u32 %v1030_v51, %v4400_v33  ;;  %vm644_vm4 = vcmp.eq.s32.totalorder %v642_v18, 0 }
 0x14a   : > { %v1999_v27 = vsel %vm274_vm0, %v547_v59, %v1377_v31  ;;  %v646_v11 = vsel %vm644_vm4, %v4047_v41, %v645_v50  ;;  %vm647_vm2 = vcmp.eq.s32.totalorder %v642_v18, 2  ;;  %v648_v9 = vxor.u32 2147483648, %v4047_v41 }
 0x14b   : > { %v2018_v0 = vsel %vm2006_vm7, %v2008_v63, %v1999_v27  ;;  %3579 = vsinq.f32 %v1156_v23  ;;  %v1032_v40 = vclz %v3119_v34  ;;  %v1471_v48 = vand.u32 3, %v4031_v37  ;;  %v2010_v63 = vld [vmem:[%s4352_s8 + $0x18] sm:$0xff] }
 0x14c   : > { %3311 = vmatmul.mubr.msk.f32.vlgmr.msra.gmra.mrb[0].mxu0 %vm2033_vm10, %v2018_v0  ;;  %v745_v56 = vadd.s32 3, %v4036_v32  ;;  %v4430_v61 = vpop.eup %3575  ;;  %v649_v46 = vsel %vm647_vm2, %v648_v9, %v4068_v47  ;;  %vm744_vm8 = vweird.f32 %v3761_v30  ;;  %v749_v36 = vxor.u32 2147483648, %v4214_v57 }
 0x14d   : > { %v752_v45 = vxor.u32 2147483648, %v4210_v53  ;;  %v1574_v7 = vand.u32 3, %v4036_v32  ;;  %v3120_v2 = vadd.s32 4294967294, %v1032_v40  ;;  %v650_v22 = vsel %vm643_vm3, %v646_v11, %v649_v46  ;;  %v2009_v32 = vld [vmem:[%s4352_s8 + $0x10] sm:$0xff] }
 0x14e   : > { %vm1472_vm9 = vcmp.lt.s32.totalorder %v1471_v48, 2  ;;  %vm1473_vm11 = vcmp.eq.s32.totalorder %v1471_v48, 0  ;;  %v651_v37 = vsel %vm640_vm15, nan, %v650_v22  ;;  %vm1476_vm6 = vcmp.eq.s32.totalorder %v1471_v48, 2  ;;  %v2011_v22 = vld [vmem:[%s4352_s8 + $0x20] sm:$0xff] }
 0x14f   : > { %v1475_v26 = vsel %vm1473_vm11, %v4047_v41, %v645_v50  ;;  %v746_v12 = vand.u32 3, %v745_v56  ;;  %vm3121_vm13 = vcmp.lt.s32.totalorder %v3120_v2, 0  ;;  %v1478_v3 = vsel %vm1476_vm6, %v648_v9, %v4068_v47 }
 0x150   : > { %vm1575_vm12 = vcmp.lt.s32.totalorder %v1574_v7, 2  ;;  %vm1576_vm14 = vcmp.eq.s32.totalorder %v1574_v7, 0  ;;  %v1035_v54 = vsel %vm3121_vm13, 0, %v3120_v2  ;;  %v1479_v55 = vsel %vm1472_vm9, %v1475_v26, %v1478_v3 }
 0x151   : > { %vm747_vm4 = vcmp.lt.s32.totalorder %v746_v12, 2  ;;  %vm748_vm2 = vcmp.eq.s32.totalorder %v746_v12, 0  ;;  %v1036_v25 = vsub.s32 32, %v1035_v54  ;;  %v1037_v58 = vshll.u32 %v4400_v33, %v1035_v54 }
 0x152   : > { %v1040_v49 = vsub.s32 4294967266, %v1035_v54  ;;  %v1480_v4 = vsel %vm640_vm15, nan, %v1479_v55  ;;  %v750_v52 = vsel %vm748_vm2, %v4210_v53, %v749_v36  ;;  %vm751_vm3 = vcmp.eq.s32.totalorder %v746_v12, 2 }
 0x153   : > { %v2000_v41 = vsel %vm274_vm0, %v651_v37, %v1480_v4  ;;  %v1578_v47 = vsel %vm1576_vm14, %v4210_v53, %v749_v36  ;;  %v4450_v18 = vpop.eup %3577  ;;  %vm966_vm9 = vcmp.lt.s32.totalorder %v4192_v44, 0  ;;  %v1038_v60 = vshrl.u32 %v4394_v6, %v1036_v25 }
 0x154   : > { %v1041_v33 = vadd.s32 127, %v1040_v49  ;;  %v2019_v21 = vsel %vm2006_vm7, %v2009_v32, %v2000_v41  ;;  %v753_v14 = vsel %vm751_vm3, %v752_v45, %v4214_v57  ;;  %vm1579_vm15 = vcmp.eq.s32.totalorder %v1574_v7, 2 }
 0x155   : > { %3313 = vmatprep.mubr.msk.f32.mxu0 %vm2033_vm10, %v2019_v21  ;;  %v754_v59 = vsel %vm747_vm4, %v750_v52, %v753_v14  ;;  %vm848_vm11 = vweird.f32 %v3932_v38  ;;  %v849_v53 = vadd.s32 3, %v4261_v39  ;;  %v4461_v17 = vpop.eup %3579  ;;  %v1039_v43 = vor.u32 %v1038_v60, %v1037_v58  ;;  %v2012_v52 = vld [vmem:[%s4352_s8 + $0x28] sm:$0xff] }
 0x156   : > { %v1042_v35 = vshll.u32 %v1041_v33, 23  ;;  %v755_v6 = vsel %vm744_vm8, nan, %v754_v59  ;;  %v1581_v51 = vsel %vm1579_vm15, %v752_v45, %v4214_v57  ;;  %v853_v31 = vxor.u32 2147483648, %v4430_v61 }
 0x157   : > { %v1582_v29 = vsel %vm1575_vm12, %v1578_v47, %v1581_v51  ;;  %v850_v23 = vand.u32 3, %v849_v53  ;;  %v856_v50 = vxor.u32 2147483648, %v4412_v5  ;;  %v1046_v27 = vcvt.s32.f32 %v1039_v43 }
 0x158   : > { %v1043_v34 = vor.u32 4788187, %v1042_v35  ;;  %v1583_v0 = vsel %vm744_vm8, nan, %v1582_v29  ;;  %v1677_v11 = vand.u32 3, %v4261_v39  ;;  %v1051_v7 = vsel %vm966_vm9, %v1050_v16, %v4389_v24 }
 0x159   : > { %v2001_v9 = vsel %vm274_vm0, %v755_v6, %v1583_v0  ;;  %vm851_vm6 = vcmp.lt.s32.totalorder %v850_v23, 2  ;;  %vm852_vm13 = vcmp.eq.s32.totalorder %v850_v23, 0  ;;  %vm855_vm14 = vcmp.eq.s32.totalorder %v850_v23, 2 }
 0x15a   : > { %v1044_v57 = vand.u32 2147483647, %v1043_v34  ;;  %v2020_v40 = vsel %vm2006_vm7, %v2010_v63, %v2001_v9  ;;  %v854_v48 = vsel %vm852_vm13, %v4412_v5, %v853_v31  ;;  %v857_v56 = vsel %vm855_vm14, %v856_v50, %v4430_v61 }
 0x15b   : > { %3314 = vmatmul.mubr.msk.f32.gmra.mrb[2].mxu0 %vm2033_vm10, %v2020_v40  ;;  %v858_v30 = vsel %vm851_vm6, %v854_v48, %v857_v56  ;;  %vm1678_vm8 = vcmp.lt.s32.totalorder %v1677_v11, 2  ;;  %vm1679_vm12 = vcmp.eq.s32.totalorder %v1677_v11, 0  ;;  %vm1682_vm4 = vcmp.eq.s32.totalorder %v1677_v11, 2  ;;  %v2013_v48 = vld [vmem:[%s4352_s8 + $0x30] sm:$0xff] }
 0x15c   : > { %v1047_v39 = vmul.f32 %v1046_v27, %v1044_v57  ;;  %v859_v46 = vsel %vm848_vm11, nan, %v858_v30  ;;  %v1681_v36 = vsel %vm1679_vm12, %v4412_v5, %v853_v31  ;;  %v1684_v45 = vsel %vm1682_vm4, %v856_v50, %v4430_v61 }
 0x15d   : > { %v1685_v2 = vsel %vm1678_vm8, %v1681_v36, %v1684_v45  ;;  %v953_v37 = vadd.s32 3, %v4182_v8  ;;  %v957_v26 = vxor.u32 2147483648, %v4310_v62  ;;  %v960_v5 = vxor.u32 2147483648, %v4304_v42  ;;  %v2243_v45 = vld [vmem:[%s4789_s3 + $0x18] sm:$0xff] }
 0x15e   : > { %v1048_v12 = vxor.u32 2147483648, %v1047_v39  ;;  %v1686_v3 = vsel %vm848_vm11, nan, %v1685_v2  ;;  %v1780_v61 = vand.u32 3, %v4182_v8  ;;  %v1155_v24 = vsel %vm1070_vm5, %v1154_v1, %v4284_v19  ;;  %v2245_v2 = vld [vmem:[%s4789_s3 + $0x28] sm:$0xff] }
 0x15f   : > { %vm965_vm2 = vcmp.le.f32.partialorder %v964_v15, 0.7853982  ;;  %v2002_v16 = vsel %vm274_vm0, %v859_v46, %v1686_v3  ;;  %v954_v54 = vand.u32 3, %v953_v37  ;;  %v1157_v58 = vsel %vm4378_vm1, 0, %v1155_v24  ;;  %v2014_v46 = vld [vmem:[%s4352_s8 + $0x38] sm:$0xff] }
 0x160   : > { %v1049_v38 = vsel %vm966_vm9, %v1048_v12, %v1047_v39  ;;  %v1053_v55 = vsel %vm965_vm2, 0, %v1051_v7  ;;  %v2021_v8 = vsel %vm2006_vm7, %v2011_v22, %v2002_v16  ;;  %vm1782_vm3 = vcmp.eq.s32.totalorder %v1780_v61, 0  ;;  %v2244_v7 = vld [vmem:[%s4789_s3 + $0x20] sm:$0xff]  ;;  %v2402_v3 = vld [vmem:[%s4789_s3 + $0x58] sm:$0xff]  ;;  %v2405_v16 = vld [vmem:[%s4789_s3 + $0x70] sm:$0xff] }
 0x161   : > { %v1052_v32 = vsel %vm965_vm2, %v4192_v44, %v1049_v38  ;;  %3316 = vmatprep.mubr.msk.f32.mxu0 %vm2033_vm10, %v2021_v8  ;;  %vm955_vm5 = vcmp.lt.s32.totalorder %v954_v54, 2  ;;  %vm956_vm15 = vcmp.eq.s32.totalorder %v954_v54, 0  ;;  %vm959_vm11 = vcmp.eq.s32.totalorder %v954_v54, 2  ;;  %v2248_v12 = vld [vmem:[%s4789_s3 + $0x40] sm:$0xff] }
 0x162   : > { %3581 = vcosq.f32 %v1052_v32  ;;  %v958_v15 = vsel %vm956_vm15, %v4304_v42, %v957_v26  ;;  %v961_v19 = vsel %vm959_vm11, %v960_v5, %v4310_v62  ;;  %v1784_v1 = vsel %vm1782_vm3, %v4304_v42, %v957_v26  ;;  %v2247_v26 = vld [vmem:[%s4789_s3 + $0x38] sm:$0xff]  ;;  %v2407_v8 = vld [vmem:[%s4789_s3 + $0x80] sm:$0xff] }
 0x163   : > { %3583 = vsinq.f32 %v1052_v32  ;;  %vm952_vm9 = vweird.f32 %v3922_v20  ;;  %v962_v25 = vsel %vm955_vm5, %v958_v15, %v961_v19  ;;  %vm1785_vm6 = vcmp.eq.s32.totalorder %v1780_v61, 2  ;;  %v2249_v32 = vld [vmem:[%s4789_s3 + $0x48] sm:$0xff]  ;;  %v2250_v15 = vld [vmem:[%s4789_s3 + $0x50] sm:$0xff] }
 0x164   : > { %v963_v49 = vsel %vm952_vm9, nan, %v962_v25  ;;  %vm1781_vm13 = vcmp.lt.s32.totalorder %v1780_v61, 2  ;;  %v1787_v4 = vsel %vm1785_vm6, %v960_v5, %v4310_v62  ;;  %v1057_v47 = vadd.s32 3, %v1053_v55  ;;  %v2403_v5 = vld [vmem:[%s4789_s3 + $0x60] sm:$0xff]  ;;  %v2404_v61 = vld [vmem:[%s4789_s3 + $0x68] sm:$0xff] }
 0x165   : > { %v1788_v41 = vsel %vm1781_vm13, %v1784_v1, %v1787_v4  ;;  %v1161_v42 = vadd.s32 3, %v1157_v58  ;;  %v1165_v21 = vxor.u32 2147483648, %v4461_v17  ;;  %v1168_v28 = vxor.u32 2147483648, %v4450_v18  ;;  %v4593_v25 = vld [vmem:[%s4790_s4] ss:$0 sm:$0xff] }
 0x166   : > { %v1789_v60 = vsel %vm952_vm9, nan, %v1788_v41  ;;  %v1986_v14 = vand.u32 3, %v1157_v58  ;;  %v1058_v59 = vand.u32 3, %v1057_v47  ;;  %v1883_v53 = vand.u32 3, %v1053_v55  ;;  %v2406_v55 = vld [vmem:[%s4789_s3 + $0x78] sm:$0xff] }
 0x167   : > { %v2003_v33 = vsel %vm274_vm0, %v963_v49, %v1789_v60  ;;  %v1162_v62 = vand.u32 3, %v1161_v42  ;;  %vm1160_vm1 = vweird.f32 %v4006_v13  ;;  %v3438_v22 = vpack.c.bf16 %v2244_v7, %v2243_v45 }
 0x168   : > { %v2022_v20 = vsel %vm2006_vm7, %v2012_v52, %v2003_v33  ;;  %vm1987_vm14 = vcmp.lt.s32.totalorder %v1986_v14, 2  ;;  %vm1988_vm8 = vcmp.eq.s32.totalorder %v1986_v14, 0  ;;  %vm1991_vm2 = vcmp.eq.s32.totalorder %v1986_v14, 2 }
 0x169   : > { %3317 = vmatmul.mubr.msk.f32.gmra.mrb[4].mxu0 %vm2033_vm10, %v2022_v20  ;;  %vm1164_vm12 = vcmp.eq.s32.totalorder %v1162_v62, 0  ;;  %vm1167_vm4 = vcmp.eq.s32.totalorder %v1162_v62, 2  ;;  %v1990_v43 = vsel %vm1988_vm8, %v4450_v18, %v1165_v21  ;;  %vm1163_vm3 = vcmp.lt.s32.totalorder %v1162_v62, 2  ;;  %3439 = vmatprep.subr.bf16.mxu1 %v3438_v22 }
 0x16a   : > { %v1166_v6 = vsel %vm1164_vm12, %v4450_v18, %v1165_v21  ;;  %v1169_v51 = vsel %vm1167_vm4, %v1168_v28, %v4461_v17  ;;  %v1993_v29 = vsel %vm1991_vm2, %v1168_v28, %v4461_v17  ;;  %vm1060_vm5 = vcmp.eq.s32.totalorder %v1058_v59, 0  ;;  %3441 = vmatpush3.bf16.msra.mxu1 %v3438_v22 }
 0x16b   : > { %v1170_v31 = vsel %vm1163_vm3, %v1166_v6, %v1169_v51  ;;  %v1994_v50 = vsel %vm1987_vm14, %v1990_v43, %v1993_v29  ;;  %vm1063_vm15 = vcmp.eq.s32.totalorder %v1058_v59, 2  ;;  %vm1885_vm11 = vcmp.eq.s32.totalorder %v1883_v53, 0 }
 0x16c   : > { %v3582_v35 = vpop.eup %3581  ;;  %vm1888_vm9 = vcmp.eq.s32.totalorder %v1883_v53, 2  ;;  %v1171_v18 = vsel %vm1160_vm1, nan, %v1170_v31  ;;  %v1995_v11 = vsel %vm1160_vm1, nan, %v1994_v50  ;;  %vm1059_vm6 = vcmp.lt.s32.totalorder %v1058_v59, 2 }
 0x16d   : > { %v3584_v63 = vpop.eup %3583  ;;  %v1064_v23 = vxor.u32 2147483648, %v3582_v35  ;;  %vm1884_vm13 = vcmp.lt.s32.totalorder %v1883_v53, 2  ;;  %vm1056_vm14 = vweird.f32 %v4192_v44  ;;  %v2005_v39 = vsel %vm274_vm0, %v1171_v18, %v1995_v11 }
 0x16e   : > { %v1061_v34 = vxor.u32 2147483648, %v3584_v63  ;;  %v2024_v44 = vsel %vm2006_vm7, %v2014_v46, %v2005_v39  ;;  %v3442_v37 = vpack.c.bf16 %v2246_v10, %v2245_v2  ;;  %v3454_v24 = vpack.c.bf16 %v2403_v5, %v2402_v3 }
 0x16f   : > { %v1065_v27 = vsel %vm1063_vm15, %v1064_v23, %v3584_v63  ;;  %v1890_v0 = vsel %vm1888_vm9, %v1064_v23, %v3584_v63  ;;  %v3446_v54 = vpack.c.bf16 %v2248_v12, %v2247_v26  ;;  %v3458_v38 = vpack.c.bf16 %v2405_v16, %v2404_v61 }
 0x170   : > { %v1062_v17 = vsel %vm1060_vm5, %v3582_v35, %v1061_v34  ;;  %v1887_v9 = vsel %vm1885_vm11, %v3582_v35, %v1061_v34  ;;  %3443 = vmatprep.subr.bf16.mxu1 %v3442_v37  ;;  %3455 = vmatprep.subr.bf16.mxu0 %v3454_v24  ;;  %v3462_v19 = vpack.c.bf16 %v2407_v8, %v2406_v55 }
 0x171   : > { %v1066_v57 = vsel %vm1059_vm6, %v1062_v17, %v1065_v27  ;;  %v1891_v40 = vsel %vm1884_vm13, %v1887_v9, %v1890_v0  ;;  %3457 = vmatpush3.bf16.msra.mxu0 %v3454_v24  ;;  %3445 = vmatpush3.bf16.msra.mxu1 %v3442_v37  ;;  %v3450_v1 = vpack.c.bf16 %v2250_v15, %v2249_v32 }
 0x172   : > { %v1067_v56 = vsel %vm1056_vm14, nan, %v1066_v57  ;;  %v1892_v30 = vsel %vm1056_vm14, nan, %v1891_v40  ;;  %3459 = vmatprep.subr.bf16.mxu0 %v3458_v38  ;;  %3447 = vmatprep.subr.bf16.mxu1 %v3446_v54 }
 0x173   : > { %v2004_v36 = vsel %vm274_vm0, %v1067_v56, %v1892_v30  ;;  %vm2256_vm0 = vcmask 523264  }
 0x174   : > { %v2023_v13 = vsel %vm2006_vm7, %v2013_v48, %v2004_v36  ;;  %vm2988_vm7 = vcmask 23552  }
 0x175   : > { %3319 = vmatprep.mubr.msk.f32.mxu0 %vm2033_vm10, %v2023_v13  ;;  %3461 = vmatpush3.bf16.msra.mxu0 %v3458_v38 }
 0x176   : > { %3320 = vmatmul.mubr.msk.f32.gmra.mrb[6].mxu0 %vm2033_vm10, %v2024_v44  ;;  %3449 = vmatpush3.bf16.msra.mxu1 %v3446_v54 }
 0x177   : > { %3463 = vmatprep.subr.bf16.mxu0 %v3462_v19  ;;  %3451 = vmatprep.subr.bf16.mxu1 %v3450_v1 }
 0x179   : > { %3465 = vmatpush3.bf16.msra.mxu0 %v3462_v19 }
 0x17a   : > { %3453 = vmatpush3.bf16.msra.mxu1 %v3450_v1 }
 0x21f   : > { %v3312_v58 = vpop.f32.mrb[0].mxu0 }
 0x220   : > { %v2130_v49 = vadd.f32 %v3312_v58, %v4593_v25  ;;  %v2124_v4 = vpop.f32.mrb[1].mxu0 }
 0x221   : > { %v2125_v41 = vadd.f32 %v4593_v25, %v2124_v4 }
 0x222   : > { %v2164_v52 = vmin.f32 %v2130_v49, 20.0 }
 0x223   : > { %v2163_v47 = vmin.f32 %v2125_v41, 20.0 }
 0x224   : > { %v2173_v60 = vmul.f32 1.442695, %v2164_v52 }
 0x225   : > { %v2171_v33 = vmul.f32 1.442695, %v2163_v47 }
 0x226   : > { %3585 = vpow2.f32 %v2173_v60 }
 0x227   : > { %3587 = vpow2.f32 %v2171_v33 }
 0x22e   : > { %v3315_v42 = vpop.f32.mrb[2].mxu0 }
 0x22f   : > { %v4598_v21 = vadd.f32 %v3315_v42, %v4593_v25  ;;  %v2134_v20 = vpop.f32.mrb[3].mxu0 }
 0x230   : > { %v3586_v28 = vpop.eup %3585  ;;  %v2135_v14 = vadd.f32 %v4593_v25, %v2134_v20 }
 0x231   : > { %v3588_v59 = vpop.eup %3587  ;;  %v2188_v62 = vadd.f32 1.0, %v3586_v28  ;;  %v2166_v53 = vmin.f32 %v4598_v21, 20.0 }
 0x232   : > { %v2187_v43 = vadd.f32 1.0, %v3588_v59  ;;  %v2165_v35 = vmin.f32 %v2135_v14, 20.0 }
 0x233   : > { %v2196_v6 = vmul.f32 %v2188_v62, %v2188_v62  ;;  %v2177_v51 = vmul.f32 1.442695, %v2166_v53 }
 0x234   : > { %v2195_v29 = vmul.f32 %v2187_v43, %v2187_v43  ;;  %v2175_v63 = vmul.f32 1.442695, %v2165_v35 }
 0x235   : > { %v2220_v23 = vadd.f32 1.0, %v2196_v6  ;;  %3589 = vpow2.f32 %v2177_v51  ;;  %v3168_v18 = vadd.f32 -1.0, %v2196_v6 }
 0x236   : > { %v2219_v31 = vadd.f32 1.0, %v2195_v29  ;;  %3591 = vpow2.f32 %v2175_v63  ;;  %v3167_v34 = vadd.f32 -1.0, %v2195_v29 }
 0x237   : > { %3593 = vrcp.f32 %v2220_v23  ;;  %v2212_v13 = vmul.f32 %v3168_v18, %v2130_v49 }
 0x238   : > { %3595 = vrcp.f32 %v2219_v31  ;;  %v2211_v30 = vmul.f32 %v3167_v34, %v2125_v41 }
 0x23c   : > { %v3318_v50 = vpop.f32.mrb[4].mxu0 }
 0x23d   : > { %v4603_v27 = vadd.f32 %v3318_v50, %v4593_v25  ;;  %v2144_v0 = vpop.f32.mrb[5].mxu0 }
 0x23e   : > { %v4606_v11 = vadd.f32 %v4593_v25, %v2144_v0 }
 0x23f   : > { %v3590_v17 = vpop.eup %3589  ;;  %v2168_v9 = vmin.f32 %v4603_v27, 20.0 }
 0x240   : > { %v3592_v57 = vpop.eup %3591  ;;  %v2190_v40 = vadd.f32 1.0, %v3590_v17  ;;  %v2167_v48 = vmin.f32 %v4606_v11, 20.0 }
 0x241   : > { %v3594_v56 = vpop.eup %3593  ;;  %v2189_v39 = vadd.f32 1.0, %v3592_v57  ;;  %v2181_v46 = vmul.f32 1.442695, %v2168_v9 }
 0x242   : > { %v3596_v36 = vpop.eup %3595  ;;  %v2198_v44 = vmul.f32 %v2190_v40, %v2190_v40  ;;  %v2179_v45 = vmul.f32 1.442695, %v2167_v48  ;;  %v2236_v22 = vmul.f32 %v3594_v56, %v2212_v13  ;;  %v2409_v40 = vld [vmem:[%s4789_s3 + $0x90] sm:$0xff]  ;;  %v3175_v56 = vld [vmem:[%s4790_s4 + $0x1] ss:$0 sm:$0xff]  ;;  %v2387_v13 = vld [vmem:[%s4633_s24 + $0x8] sm:$0xff] }
 0x243   : > { %v2197_v7 = vmul.f32 %v2189_v39, %v2189_v39  ;;  %3597 = vpow2.f32 %v2181_v46  ;;  %v2235_v2 = vmul.f32 %v3596_v36, %v2211_v30  ;;  %v2386_v36 = vld [vmem:[%s4633_s24] sm:$0xff] }
 0x244   : > { %v2222_v10 = vadd.f32 1.0, %v2198_v44  ;;  %3599 = vpow2.f32 %v2179_v45  ;;  %v3170_v54 = vadd.f32 -1.0, %v2198_v44 }
 0x245   : > { %v2221_v37 = vadd.f32 1.0, %v2197_v7  ;;  %3338 = vmatprep.mubr.msk.f32.mxu1 %vm2256_vm0, %v2235_v2  ;;  %v3169_v61 = vadd.f32 -1.0, %v2197_v7 }
 0x246   : > { %3601 = vrcp.f32 %v2222_v10  ;;  %3339 = vmatmul.mubr.msk.f32.vlgmr.msra.gmra.mrb[0].mxu1 %vm2256_vm0, %v2236_v22  ;;  %v2214_v41 = vmul.f32 %v3170_v54, %v4598_v21  ;;  %v2390_v54 = vld [vmem:[%s4633_s24 + $0x20] sm:$0xff] }
 0x247   : > { %3603 = vrcp.f32 %v2221_v37  ;;  %v2213_v58 = vmul.f32 %v3169_v61, %v2135_v14  ;;  %v2388_v37 = vld [vmem:[%s4633_s24 + $0x10] sm:$0xff] }
 0x249   : > { %v3321_v26 = vpop.f32.mrb[6].mxu0 }
 0x24a   : > { %v2160_v12 = vadd.f32 %v3321_v26, %v4593_v25  ;;  %v2154_v3 = vpop.f32.mrb[7].mxu0  ;;  %v2389_v26 = vld [vmem:[%s4633_s24 + $0x18] sm:$0xff] }
 0x24b   : > { %v2155_v5 = vadd.f32 %v4593_v25, %v2154_v3 }
 0x24c   : > { %v2170_v24 = vmin.f32 %v2160_v12, 20.0 }
 0x24d   : > { %v3598_v16 = vpop.eup %3597  ;;  %v2169_v38 = vmin.f32 %v2155_v5, 20.0 }
 0x24e   : > { %v3600_v55 = vpop.eup %3599  ;;  %v2192_v8 = vadd.f32 1.0, %v3598_v16  ;;  %v2185_v32 = vmul.f32 1.442695, %v2170_v24 }
 0x24f   : > { %v2191_v15 = vadd.f32 1.0, %v3600_v55  ;;  %v2183_v19 = vmul.f32 1.442695, %v2169_v38  ;;  %v2391_v38 = vld [vmem:[%s4633_s24 + $0x28] sm:$0xff] }
 0x250   : > { %v3602_v1 = vpop.eup %3601  ;;  %v2200_v49 = vmul.f32 %v2192_v8, %v2192_v8  ;;  %3605 = vpow2.f32 %v2185_v32 }
 0x251   : > { %v3604_v4 = vpop.eup %3603  ;;  %v2199_v52 = vmul.f32 %v2191_v15, %v2191_v15  ;;  %3607 = vpow2.f32 %v2183_v19  ;;  %v2238_v60 = vmul.f32 %v3602_v1, %v2214_v41 }
 0x252   : > { %v2237_v25 = vmul.f32 %v3604_v4, %v2213_v58  ;;  %v2224_v47 = vadd.f32 1.0, %v2200_v49  ;;  %v3172_v14 = vadd.f32 -1.0, %v2200_v49  ;;  %v2392_v58 = vld [vmem:[%s4633_s24 + $0x30] sm:$0xff]  ;;  %v2393_v49 = vld [vmem:[%s4633_s24 + $0x38] sm:$0xff] }
 0x253   : > { %v2223_v33 = vadd.f32 1.0, %v2199_v52  ;;  %v3171_v20 = vadd.f32 -1.0, %v2199_v52 }
 0x254   : > { %3609 = vrcp.f32 %v2224_v47  ;;  %3341 = vmatprep.mubr.msk.f32.mxu1 %vm2256_vm0, %v2237_v25  ;;  %v2216_v51 = vmul.f32 %v3172_v14, %v4603_v27  ;;  %v2408_v27 = vld [vmem:[%s4789_s3 + $0x88] sm:$0xff]  ;;  %v2624_v25 = vld [vmem:[%s4789_s3 + $0x98] sm:$0xff]  ;;  %v2625_v47 = vld [vmem:[%s4789_s3 + $0xa0] sm:$0xff] }
 0x255   : > { %3611 = vrcp.f32 %v2223_v33  ;;  %3342 = vmatmul.mubr.msk.f32.gmra.mrb[2].mxu1 %vm2256_vm0, %v2238_v60  ;;  %v2215_v43 = vmul.f32 %v3171_v20, %v4606_v11  ;;  %v3466_v48 = vpack.c.bf16 %v2409_v40, %v2408_v27  ;;  %v2626_v60 = vld [vmem:[%s4789_s3 + $0xa8] sm:$0xff]  ;;  %v3470_v33 = vpack.c.bf16 %v2625_v47, %v2624_v25  ;;  %v2629_v14 = vld [vmem:[%s4789_s3 + $0xc0] sm:$0xff] }
 0x257   : > { %3467 = vmatprep.subr.bf16.mxu0 %v3466_v48  ;;  %3471 = vmatprep.subr.bf16.mxu1 %v3470_v33 }
 0x258   : > { %3469 = vmatpush3.bf16.msra.mxu0 %v3466_v48  ;;  %3473 = vmatpush3.bf16.msra.mxu1 %v3470_v33 }
 0x25a   : > { %v3606_v42 = vpop.eup %3605 }
 0x25b   : > { %v3608_v28 = vpop.eup %3607  ;;  %v2194_v59 = vadd.f32 1.0, %v3606_v42  ;;  %v2627_v42 = vld [vmem:[%s4789_s3 + $0xb0] sm:$0xff] }
 0x25c   : > { %v2193_v62 = vadd.f32 1.0, %v3608_v28  ;;  %v3474_v20 = vpack.c.bf16 %v2627_v42, %v2626_v60  ;;  %v2628_v28 = vld [vmem:[%s4789_s3 + $0xb8] sm:$0xff] }
 0x25d   : > { %v2202_v53 = vmul.f32 %v2194_v59, %v2194_v59  ;;  %v3478_v59 = vpack.c.bf16 %v2629_v14, %v2628_v28 }
 0x25e   : > { %v3610_v21 = vpop.eup %3609  ;;  %v2201_v35 = vmul.f32 %v2193_v62, %v2193_v62  ;;  %3475 = vmatprep.subr.bf16.mxu1 %v3474_v20  ;;  %v2630_v62 = vld [vmem:[%s4789_s3 + $0xc8] sm:$0xff] }
 0x25f   : > { %v3612_v6 = vpop.eup %3611  ;;  %v2226_v29 = vadd.f32 1.0, %v2202_v53  ;;  %v2240_v31 = vmul.f32 %v3610_v21, %v2216_v51  ;;  %v3174_v34 = vadd.f32 -1.0, %v2202_v53  ;;  %v2631_v53 = vld [vmem:[%s4789_s3 + $0xd0] sm:$0xff]  ;;  %3477 = vmatpush3.bf16.msra.mxu1 %v3474_v20 }
 0x260   : > { %v2239_v63 = vmul.f32 %v3612_v6, %v2215_v43  ;;  %v2225_v23 = vadd.f32 1.0, %v2201_v35  ;;  %v3173_v50 = vadd.f32 -1.0, %v2201_v35  ;;  %3479 = vmatprep.subr.bf16.mxu1 %v3478_v59  ;;  %v3482_v21 = vpack.c.bf16 %v2631_v53, %v2630_v62  ;;  %v4681_v43 = vld [vmem:[%s4790_s4 + $0x2] ss:$0 sm:$0xff] }
 0x261   : > { %3613 = vrcp.f32 %v2226_v29  ;;  %v2218_v17 = vmul.f32 %v3174_v34, %v2160_v12 }
 0x262   : > { %3615 = vrcp.f32 %v2225_v23  ;;  %3344 = vmatprep.mubr.msk.f32.mxu1 %vm2256_vm0, %v2239_v63  ;;  %v2217_v18 = vmul.f32 %v3173_v50, %v2155_v5 }
 0x263   : > { %3345 = vmatmul.mubr.msk.f32.gmra.mrb[4].mxu1 %vm2256_vm0, %v2240_v31 }
 0x264   : > { %3481 = vmatpush3.bf16.msra.mxu1 %v3478_v59 }
 0x265   : > { %3483 = vmatprep.subr.bf16.mxu1 %v3482_v21 }
 0x268   : > { %3485 = vmatpush3.bf16.msra.mxu1 %v3482_v21 }
 0x26b   : > { %v3614_v0 = vpop.eup %3613 }
 0x26c   : > { %v3616_v11 = vpop.eup %3615  ;;  %v2242_v57 = vmul.f32 %v3614_v0, %v2218_v17 }
 0x26d   : > { %v2241_v9 = vmul.f32 %v3616_v11, %v2217_v18 }
 0x26f   : > { %3347 = vmatprep.mubr.msk.f32.mxu1 %vm2256_vm0, %v2241_v9 }
 0x270   : > { %3348 = vmatmul.mubr.msk.f32.gmra.mrb[6].mxu1 %vm2256_vm0, %v2242_v57 }
 0x319   : > { %v3340_v30 = vpop.f32.mrb[0].mxu1 }
 0x31a   : > { %v2353_v39 = vadd.f32 %v3340_v30, %v3175_v56  ;;  %v2347_v46 = vpop.f32.mrb[1].mxu1 }
 0x31b   : > { %v2348_v44 = vadd.f32 %v3175_v56, %v2347_v46 }
 0x31c   : > { %v2395_v7 = vadd.f32 %v2387_v13, %v2353_v39 }
 0x31d   : > { %v2394_v45 = vadd.f32 %v2386_v36, %v2348_v44 }
 0x31f   : > { %3366 = vmatprep.mubr.msk.f32.mxu0 %vm2256_vm0, %v2394_v45 }
 0x320   : > { %3367 = vmatmul.mubr.msk.f32.vlgmr.msra.gmra.mrb[8].mxu0 %vm2256_vm0, %v2395_v7 }
 0x328   : > { %v3343_v2 = vpop.f32.mrb[2].mxu1 }
 0x329   : > { %v2363_v22 = vadd.f32 %v3343_v2, %v3175_v56  ;;  %v2357_v10 = vpop.f32.mrb[3].mxu1 }
 0x32a   : > { %v2358_v12 = vadd.f32 %v3175_v56, %v2357_v10 }
 0x32b   : > { %v2397_v5 = vadd.f32 %v2389_v26, %v2363_v22 }
 0x32c   : > { %v2396_v3 = vadd.f32 %v2388_v37, %v2358_v12 }
 0x32e   : > { %3369 = vmatprep.mubr.msk.f32.mxu0 %vm2256_vm0, %v2396_v3 }
 0x32f   : > { %3370 = vmatmul.mubr.msk.f32.gmra.mrb[10].mxu0 %vm2256_vm0, %v2397_v5 }
 0x336   : > { %v3346_v61 = vpop.f32.mrb[4].mxu1 }
 0x337   : > { %v2373_v24 = vadd.f32 %v3346_v61, %v3175_v56  ;;  %v2367_v16 = vpop.f32.mrb[5].mxu1 }
 0x338   : > { %v2368_v55 = vadd.f32 %v3175_v56, %v2367_v16 }
 0x339   : > { %v2399_v32 = vadd.f32 %v2391_v38, %v2373_v24 }
 0x33a   : > { %v2398_v8 = vadd.f32 %v2390_v54, %v2368_v55 }
 0x33c   : > { %3372 = vmatprep.mubr.msk.f32.mxu0 %vm2256_vm0, %v2398_v8 }
 0x33d   : > { %3373 = vmatmul.mubr.msk.f32.gmra.mrb[12].mxu0 %vm2256_vm0, %v2399_v32 }
 0x343   : > { %v3349_v15 = vpop.f32.mrb[6].mxu1 }
 0x344   : > { %v2383_v19 = vadd.f32 %v3349_v15, %v3175_v56  ;;  %v2377_v1 = vpop.f32.mrb[7].mxu1 }
 0x345   : > { %v2378_v4 = vadd.f32 %v3175_v56, %v2377_v1 }
 0x346   : > { %v2401_v52 = vadd.f32 %v2393_v49, %v2383_v19 }
 0x347   : > { %v2400_v41 = vadd.f32 %v2392_v58, %v2378_v4 }
 0x349   : > { %3375 = vmatprep.mubr.msk.f32.mxu0 %vm2256_vm0, %v2400_v41 }
 0x34a   : > { %3376 = vmatmul.mubr.msk.f32.gmra.mrb[14].mxu0 %vm2256_vm0, %v2401_v52 }
 0x3f3   : > { %v3368_v35 = vpop.f32.mrb[8].mxu0 }
 0x3f4   : > { %v2511_v6 = vadd.f32 %v3368_v35, %v4681_v43  ;;  %v2505_v51 = vpop.f32.mrb[9].mxu0 }
 0x3f5   : > { %v2506_v29 = vadd.f32 %v4681_v43, %v2505_v51 }
 0x3f6   : > { %v2545_v63 = vmin.f32 %v2511_v6, 20.0 }
 0x3f7   : > { %v2544_v23 = vmin.f32 %v2506_v29, 20.0 }
 0x3f8   : > { %v2554_v31 = vmul.f32 1.442695, %v2545_v63 }
 0x3f9   : > { %v2552_v50 = vmul.f32 1.442695, %v2544_v23 }
 0x3fa   : > { %3617 = vpow2.f32 %v2554_v31 }
 0x3fb   : > { %3619 = vpow2.f32 %v2552_v50 }
 0x402   : > { %v3371_v34 = vpop.f32.mrb[10].mxu0 }
 0x403   : > { %v4686_v0 = vadd.f32 %v3371_v34, %v4681_v43  ;;  %v2515_v18 = vpop.f32.mrb[11].mxu0 }
 0x404   : > { %v3618_v11 = vpop.eup %3617  ;;  %v2516_v17 = vadd.f32 %v4681_v43, %v2515_v18 }
 0x405   : > { %v3620_v9 = vpop.eup %3619  ;;  %v2569_v57 = vadd.f32 1.0, %v3618_v11  ;;  %v2547_v27 = vmin.f32 %v4686_v0, 20.0 }
 0x406   : > { %v2568_v40 = vadd.f32 1.0, %v3620_v9  ;;  %v2546_v48 = vmin.f32 %v2516_v17, 20.0 }
 0x407   : > { %v2577_v56 = vmul.f32 %v2569_v57, %v2569_v57  ;;  %v2558_v30 = vmul.f32 1.442695, %v2547_v27 }
 0x408   : > { %v2576_v39 = vmul.f32 %v2568_v40, %v2568_v40  ;;  %v2556_v46 = vmul.f32 1.442695, %v2546_v48 }
 0x409   : > { %v2601_v36 = vadd.f32 1.0, %v2577_v56  ;;  %3621 = vpow2.f32 %v2558_v30  ;;  %v3194_v22 = vadd.f32 -1.0, %v2577_v56 }
 0x40a   : > { %v2600_v13 = vadd.f32 1.0, %v2576_v39  ;;  %3623 = vpow2.f32 %v2556_v46  ;;  %v3193_v45 = vadd.f32 -1.0, %v2576_v39 }
 0x40b   : > { %3625 = vrcp.f32 %v2601_v36  ;;  %v2593_v55 = vmul.f32 %v3194_v22, %v2511_v6 }
 0x40c   : > { %3627 = vrcp.f32 %v2600_v13  ;;  %v2592_v24 = vmul.f32 %v3193_v45, %v2506_v29 }
 0x410   : > { %v3374_v44 = vpop.f32.mrb[12].mxu0 }
 0x411   : > { %v4691_v7 = vadd.f32 %v3374_v44, %v4681_v43  ;;  %v2525_v2 = vpop.f32.mrb[13].mxu0 }
 0x412   : > { %v4694_v10 = vadd.f32 %v4681_v43, %v2525_v2 }
 0x413   : > { %v3622_v37 = vpop.eup %3621  ;;  %v2549_v26 = vmin.f32 %v4691_v7, 20.0 }
 0x414   : > { %v3624_v12 = vpop.eup %3623  ;;  %v2571_v3 = vadd.f32 1.0, %v3622_v37  ;;  %v2548_v5 = vmin.f32 %v4694_v10, 20.0 }
 0x415   : > { %v3626_v61 = vpop.eup %3625  ;;  %v2570_v16 = vadd.f32 1.0, %v3624_v12  ;;  %v2562_v54 = vmul.f32 1.442695, %v2549_v26 }
 0x416   : > { %v3628_v38 = vpop.eup %3627  ;;  %v2579_v8 = vmul.f32 %v2571_v3, %v2571_v3  ;;  %v2560_v32 = vmul.f32 1.442695, %v2548_v5  ;;  %v2617_v1 = vmul.f32 %v3626_v61, %v2593_v55  ;;  %v2847_v3 = vld [vmem:[%s4789_s3 + $0xe0] sm:$0xff]  ;;  %v2848_v5 = vld [vmem:[%s4789_s3 + $0xe8] sm:$0xff] }
 0x417   : > { %v2616_v15 = vmul.f32 %v3628_v38, %v2592_v24  ;;  %v2578_v19 = vmul.f32 %v2570_v16, %v2570_v16  ;;  %3629 = vpow2.f32 %v2562_v54  ;;  %v2849_v24 = vld [vmem:[%s4789_s3 + $0xf0] sm:$0xff]  ;;  %v2850_v54 = vld [vmem:[%s4789_s3 + $0xf8] sm:$0xff]  ;;  %v2851_v38 = vld [vmem:[%s4789_s3 + $0x100] sm:$0xff] }
 0x418   : > { %v2603_v58 = vadd.f32 1.0, %v2579_v8  ;;  %3631 = vpow2.f32 %v2560_v32  ;;  %v3196_v42 = vadd.f32 -1.0, %v2579_v8  ;;  %v3490_v16 = vpack.c.bf16 %v2849_v24, %v2848_v5  ;;  %v2852_v8 = vld [vmem:[%s4789_s3 + $0x108] sm:$0xff]  ;;  %v2853_v32 = vld [vmem:[%s4789_s3 + $0x110] sm:$0xff] }
 0x419   : > { %v2602_v49 = vadd.f32 1.0, %v2578_v19  ;;  %3394 = vmatprep.mubr.msk.f32.mxu1 %vm2256_vm0, %v2616_v15  ;;  %v3195_v47 = vadd.f32 -1.0, %v2578_v19  ;;  %v3494_v55 = vpack.c.bf16 %v2851_v38, %v2850_v54  ;;  %v3498_v15 = vpack.c.bf16 %v2853_v32, %v2852_v8  ;;  %v4738_v19 = vld [vmem:[%s4790_s4 + $0x3] ss:$0 sm:$0xff] }
 0x41a   : > { %3633 = vrcp.f32 %v2603_v58  ;;  %3395 = vmatmul.mubr.msk.f32.vlgmr.msra.gmra.mrb[8].mxu1 %vm2256_vm0, %v2617_v1  ;;  %v2595_v29 = vmul.f32 %v3196_v42, %v4686_v0 }
 0x41b   : > { %3635 = vrcp.f32 %v2602_v49  ;;  %v2594_v35 = vmul.f32 %v3195_v47, %v2516_v17 }
 0x41d   : > { %v3377_v4 = vpop.f32.mrb[14].mxu0 }
 0x41e   : > { %v2541_v41 = vadd.f32 %v3377_v4, %v4681_v43  ;;  %v2535_v52 = vpop.f32.mrb[15].mxu0 }
 0x41f   : > { %v2536_v25 = vadd.f32 %v4681_v43, %v2535_v52 }
 0x420   : > { %v2551_v60 = vmin.f32 %v2541_v41, 20.0 }
 0x421   : > { %v3630_v33 = vpop.eup %3629  ;;  %v2550_v20 = vmin.f32 %v2536_v25, 20.0 }
 0x422   : > { %v3632_v28 = vpop.eup %3631  ;;  %v2573_v14 = vadd.f32 1.0, %v3630_v33  ;;  %v2566_v59 = vmul.f32 1.442695, %v2551_v60 }
 0x423   : > { %v2572_v62 = vadd.f32 1.0, %v3632_v28  ;;  %v2564_v53 = vmul.f32 1.442695, %v2550_v20 }
 0x424   : > { %v3634_v21 = vpop.eup %3633  ;;  %v2581_v6 = vmul.f32 %v2573_v14, %v2573_v14  ;;  %3637 = vpow2.f32 %v2566_v59 }
 0x425   : > { %v3636_v51 = vpop.eup %3635  ;;  %v2580_v63 = vmul.f32 %v2572_v62, %v2572_v62  ;;  %3639 = vpow2.f32 %v2564_v53  ;;  %v2619_v31 = vmul.f32 %v3634_v21, %v2595_v29 }
 0x426   : > { %v2618_v43 = vmul.f32 %v3636_v51, %v2594_v35  ;;  %v2605_v23 = vadd.f32 1.0, %v2581_v6  ;;  %v3198_v17 = vadd.f32 -1.0, %v2581_v6 }
 0x427   : > { %v2604_v50 = vadd.f32 1.0, %v2580_v63  ;;  %v3197_v18 = vadd.f32 -1.0, %v2580_v63 }
 0x428   : > { %3641 = vrcp.f32 %v2605_v23  ;;  %3397 = vmatprep.mubr.msk.f32.mxu1 %vm2256_vm0, %v2618_v43  ;;  %v2597_v30 = vmul.f32 %v3198_v17, %v4691_v7  ;;  %v2846_v7 = vld [vmem:[%s4789_s3 + $0xd8] sm:$0xff] }
 0x429   : > { %3643 = vrcp.f32 %v2604_v50  ;;  %3398 = vmatmul.mubr.msk.f32.gmra.mrb[10].mxu1 %vm2256_vm0, %v2619_v31  ;;  %v2596_v40 = vmul.f32 %v3197_v18, %v4694_v10  ;;  %v3486_v61 = vpack.c.bf16 %v2847_v3, %v2846_v7 }
 0x42b   : > { %3487 = vmatprep.subr.bf16.mxu0 %v3486_v61 }
 0x42c   : > { %3489 = vmatpush3.bf16.msra.mxu0 %v3486_v61 }
 0x42d   : > { %3491 = vmatprep.subr.bf16.mxu0 %v3490_v16 }
 0x42e   : > { %v3638_v34 = vpop.eup %3637 }
 0x42f   : > { %v3640_v11 = vpop.eup %3639  ;;  %v2575_v9 = vadd.f32 1.0, %v3638_v34 }
 0x430   : > { %v2574_v57 = vadd.f32 1.0, %v3640_v11  ;;  %3493 = vmatpush3.bf16.msra.mxu0 %v3490_v16 }
 0x431   : > { %v2583_v27 = vmul.f32 %v2575_v9, %v2575_v9  ;;  %3495 = vmatprep.subr.bf16.mxu0 %v3494_v55 }
 0x432   : > { %v3642_v0 = vpop.eup %3641  ;;  %v2582_v48 = vmul.f32 %v2574_v57, %v2574_v57 }
 0x433   : > { %v3644_v56 = vpop.eup %3643  ;;  %v2607_v39 = vadd.f32 1.0, %v2583_v27  ;;  %v2621_v13 = vmul.f32 %v3642_v0, %v2597_v30  ;;  %v3200_v45 = vadd.f32 -1.0, %v2583_v27 }
 0x434   : > { %v2620_v46 = vmul.f32 %v3644_v56, %v2596_v40  ;;  %v2606_v36 = vadd.f32 1.0, %v2582_v48  ;;  %v3199_v44 = vadd.f32 -1.0, %v2582_v48  ;;  %3497 = vmatpush3.bf16.msra.mxu0 %v3494_v55 }
 0x435   : > { %3645 = vrcp.f32 %v2607_v39  ;;  %v2599_v10 = vmul.f32 %v3200_v45, %v2541_v41  ;;  %3499 = vmatprep.subr.bf16.mxu0 %v3498_v15 }
 0x436   : > { %3647 = vrcp.f32 %v2606_v36  ;;  %3400 = vmatprep.mubr.msk.f32.mxu1 %vm2256_vm0, %v2620_v46  ;;  %v2598_v22 = vmul.f32 %v3199_v44, %v2536_v25 }
 0x437   : > { %3401 = vmatmul.mubr.msk.f32.gmra.mrb[12].mxu1 %vm2256_vm0, %v2621_v13 }
 0x438   : > { %3501 = vmatpush3.bf16.msra.mxu0 %v3498_v15 }
 0x43f   : > { %v3646_v2 = vpop.eup %3645 }
 0x440   : > { %v3648_v37 = vpop.eup %3647  ;;  %v2623_v12 = vmul.f32 %v3646_v2, %v2599_v10 }
 0x441   : > { %v2622_v26 = vmul.f32 %v3648_v37, %v2598_v22 }
 0x443   : > { %3403 = vmatprep.mubr.msk.f32.mxu1 %vm2256_vm0, %v2622_v26 }
 0x444   : > { %3404 = vmatmul.mubr.msk.f32.gmra.mrb[14].mxu1 %vm2256_vm0, %v2623_v12 }
 0x4ed   : > { %v3396_v1 = vpop.f32.mrb[8].mxu1 }
 0x4ee   : > { %v2733_v58 = vadd.f32 %v3396_v1, %v4738_v19  ;;  %v2727_v49 = vpop.f32.mrb[9].mxu1 }
 0x4ef   : > { %v2728_v4 = vadd.f32 %v4738_v19, %v2727_v49 }
 0x4f0   : > { %v2767_v41 = vmin.f32 %v2733_v58, 20.0 }
 0x4f1   : > { %v2766_v52 = vmin.f32 %v2728_v4, 20.0 }
 0x4f2   : > { %v2776_v25 = vmul.f32 1.442695, %v2767_v41 }
 0x4f3   : > { %v2774_v47 = vmul.f32 1.442695, %v2766_v52 }
 0x4f4   : > { %3649 = vpow2.f32 %v2776_v25 }
 0x4f5   : > { %3651 = vpow2.f32 %v2774_v47 }
 0x4fc   : > { %v3399_v60 = vpop.f32.mrb[10].mxu1 }
 0x4fd   : > { %v4743_v33 = vadd.f32 %v3399_v60, %v4738_v19  ;;  %v2737_v42 = vpop.f32.mrb[11].mxu1 }
 0x4fe   : > { %v3650_v20 = vpop.eup %3649  ;;  %v2738_v28 = vadd.f32 %v4738_v19, %v2737_v42 }
 0x4ff   : > { %v3652_v14 = vpop.eup %3651  ;;  %v2791_v59 = vadd.f32 1.0, %v3650_v20  ;;  %v2769_v62 = vmin.f32 %v4743_v33, 20.0 }
 0x500   : > { %v2790_v53 = vadd.f32 1.0, %v3652_v14  ;;  %v2768_v21 = vmin.f32 %v2738_v28, 20.0 }
 0x501   : > { %v2799_v35 = vmul.f32 %v2791_v59, %v2791_v59  ;;  %v2780_v6 = vmul.f32 1.442695, %v2769_v62 }
 0x502   : > { %v2798_v51 = vmul.f32 %v2790_v53, %v2790_v53  ;;  %v2778_v29 = vmul.f32 1.442695, %v2768_v21 }
 0x503   : > { %v2823_v63 = vadd.f32 1.0, %v2799_v35  ;;  %3653 = vpow2.f32 %v2780_v6  ;;  %v3211_v18 = vadd.f32 -1.0, %v2799_v35 }
 0x504   : > { %v2822_v43 = vadd.f32 1.0, %v2798_v51  ;;  %3655 = vpow2.f32 %v2778_v29  ;;  %v3210_v31 = vadd.f32 -1.0, %v2798_v51 }
 0x505   : > { %3657 = vrcp.f32 %v2823_v63  ;;  %v2815_v46 = vmul.f32 %v3211_v18, %v2733_v58 }
 0x506   : > { %3659 = vrcp.f32 %v2822_v43  ;;  %v2814_v48 = vmul.f32 %v3210_v31, %v2728_v4 }
 0x50a   : > { %v3402_v23 = vpop.f32.mrb[12].mxu1 }
 0x50b   : > { %v4748_v50 = vadd.f32 %v3402_v23, %v4738_v19  ;;  %v2747_v34 = vpop.f32.mrb[13].mxu1 }
 0x50c   : > { %v4751_v11 = vadd.f32 %v4738_v19, %v2747_v34 }
 0x50d   : > { %v3654_v17 = vpop.eup %3653  ;;  %v2771_v9 = vmin.f32 %v4748_v50, 20.0 }
 0x50e   : > { %v3656_v57 = vpop.eup %3655  ;;  %v2793_v27 = vadd.f32 1.0, %v3654_v17  ;;  %v2770_v0 = vmin.f32 %v4751_v11, 20.0 }
 0x50f   : > { %v3658_v40 = vpop.eup %3657  ;;  %v2792_v56 = vadd.f32 1.0, %v3656_v57  ;;  %v2784_v30 = vmul.f32 1.442695, %v2771_v9 }
 0x510   : > { %v3660_v39 = vpop.eup %3659  ;;  %v2801_v36 = vmul.f32 %v2793_v27, %v2793_v27  ;;  %v2782_v13 = vmul.f32 1.442695, %v2770_v0  ;;  %v2839_v2 = vmul.f32 %v3658_v40, %v2815_v46 }
 0x511   : > { %v2838_v44 = vmul.f32 %v3660_v39, %v2814_v48  ;;  %v2800_v45 = vmul.f32 %v2792_v56, %v2792_v56  ;;  %3661 = vpow2.f32 %v2784_v30 }
 0x512   : > { %v2825_v22 = vadd.f32 1.0, %v2801_v36  ;;  %3663 = vpow2.f32 %v2782_v13  ;;  %v3213_v24 = vadd.f32 -1.0, %v2801_v36 }
 0x513   : > { %v2824_v37 = vadd.f32 1.0, %v2800_v45  ;;  %3422 = vmatprep.mubr.msk.f32.mxu0 %vm2256_vm0, %v2838_v44  ;;  %v3212_v3 = vadd.f32 -1.0, %v2800_v45 }
 0x514   : > { %3665 = vrcp.f32 %v2825_v22  ;;  %3423 = vmatmul.mubr.msk.f32.vlgmr.msra.gmra.mrb[16].mxu0 %vm2256_vm0, %v2839_v2  ;;  %v2817_v4 = vmul.f32 %v3213_v24, %v4743_v33 }
 0x515   : > { %3667 = vrcp.f32 %v2824_v37  ;;  %v2816_v1 = vmul.f32 %v3212_v3, %v2738_v28 }
 0x517   : > { %v3405_v10 = vpop.f32.mrb[14].mxu1 }
 0x518   : > { %v2763_v26 = vadd.f32 %v3405_v10, %v4738_v19  ;;  %v2757_v12 = vpop.f32.mrb[15].mxu1 }
 0x519   : > { %v2758_v7 = vadd.f32 %v4738_v19, %v2757_v12 }
 0x51a   : > { %v2773_v5 = vmin.f32 %v2763_v26, 20.0 }
 0x51b   : > { %v3662_v61 = vpop.eup %3661  ;;  %v2772_v16 = vmin.f32 %v2758_v7, 20.0 }
 0x51c   : > { %v3664_v54 = vpop.eup %3663  ;;  %v2795_v38 = vadd.f32 1.0, %v3662_v61  ;;  %v2788_v55 = vmul.f32 1.442695, %v2773_v5 }
 0x51d   : > { %v2794_v8 = vadd.f32 1.0, %v3664_v54  ;;  %v2786_v32 = vmul.f32 1.442695, %v2772_v16 }
 0x51e   : > { %v3666_v15 = vpop.eup %3665  ;;  %v2803_v58 = vmul.f32 %v2795_v38, %v2795_v38  ;;  %3669 = vpow2.f32 %v2788_v55 }
 0x51f   : > { %v3668_v49 = vpop.eup %3667  ;;  %v2802_v41 = vmul.f32 %v2794_v8, %v2794_v8  ;;  %3671 = vpow2.f32 %v2786_v32  ;;  %v2841_v25 = vmul.f32 %v3666_v15, %v2817_v4 }
 0x520   : > { %v2840_v19 = vmul.f32 %v3668_v49, %v2816_v1  ;;  %v2827_v52 = vadd.f32 1.0, %v2803_v58  ;;  %v3215_v28 = vadd.f32 -1.0, %v2803_v58 }
 0x521   : > { %v2826_v47 = vadd.f32 1.0, %v2802_v41  ;;  %v3214_v42 = vadd.f32 -1.0, %v2802_v41 }
 0x522   : > { %3673 = vrcp.f32 %v2827_v52  ;;  %3425 = vmatprep.mubr.msk.f32.mxu0 %vm2256_vm0, %v2840_v19  ;;  %v2819_v6 = vmul.f32 %v3215_v28, %v4748_v50  ;;  %v3218_v50 = vld [vmem:[%s4790_s4 + $0x4] ss:$0 sm:$0xff] }
 0x523   : > { %3675 = vrcp.f32 %v2826_v47  ;;  %3426 = vmatmul.mubr.msk.f32.gmra.mrb[18].mxu0 %vm2256_vm0, %v2841_v25  ;;  %v2818_v53 = vmul.f32 %v3214_v42, %v4751_v11 }
 0x528   : > { %v3670_v60 = vpop.eup %3669 }
 0x529   : > { %v3672_v20 = vpop.eup %3671  ;;  %v2797_v14 = vadd.f32 1.0, %v3670_v60 }
 0x52a   : > { %v2796_v59 = vadd.f32 1.0, %v3672_v20 }
 0x52b   : > { %v2805_v62 = vmul.f32 %v2797_v14, %v2797_v14 }
 0x52c   : > { %v3674_v33 = vpop.eup %3673  ;;  %v2804_v21 = vmul.f32 %v2796_v59, %v2796_v59 }
 0x52d   : > { %v3676_v35 = vpop.eup %3675  ;;  %v2829_v51 = vadd.f32 1.0, %v2805_v62  ;;  %v2843_v43 = vmul.f32 %v3674_v33, %v2819_v6  ;;  %v3217_v31 = vadd.f32 -1.0, %v2805_v62 }
 0x52e   : > { %v2842_v29 = vmul.f32 %v3676_v35, %v2818_v53  ;;  %v2828_v63 = vadd.f32 1.0, %v2804_v21  ;;  %v3216_v23 = vadd.f32 -1.0, %v2804_v21 }
 0x52f   : > { %3677 = vrcp.f32 %v2829_v51  ;;  %v2821_v17 = vmul.f32 %v3217_v31, %v2763_v26 }
 0x530   : > { %3679 = vrcp.f32 %v2828_v63  ;;  %3428 = vmatprep.mubr.msk.f32.mxu0 %vm2256_vm0, %v2842_v29  ;;  %v2820_v18 = vmul.f32 %v3216_v23, %v2758_v7 }
 0x531   : > { %3429 = vmatmul.mubr.msk.f32.gmra.mrb[20].mxu0 %vm2256_vm0, %v2843_v43 }
 0x539   : > { %v3678_v34 = vpop.eup %3677 }
 0x53a   : > { %v3680_v11 = vpop.eup %3679  ;;  %v2845_v57 = vmul.f32 %v3678_v34, %v2821_v17 }
 0x53b   : > { %v2844_v9 = vmul.f32 %v3680_v11, %v2820_v18 }
 0x53d   : > { %3431 = vmatprep.mubr.msk.f32.mxu0 %vm2256_vm0, %v2844_v9 }
 0x53e   : > { %3432 = vmatmul.mubr.msk.f32.gmra.mrb[22].mxu0 %vm2256_vm0, %v2845_v57 }
 0x5e7   : > { %v3424_v27 = vpop.f32.mrb[16].mxu0 }
 0x5e8   : > { %v2955_v0 = vadd.f32 %v3424_v27, %v3218_v50  ;;  %v2949_v40 = vpop.f32.mrb[17].mxu0 }
 0x5e9   : > { %v2950_v48 = vadd.f32 %v3218_v50, %v2949_v40 }
 0x5ea   : > { %2990 = vst.msk [vmem:[%s270_s20 + $0x8] sm:$0xff] %vm2988_vm7, %v2955_v0 }
 0x5eb   : > { %2989 = vst.msk [vmem:[%s270_s20] sm:$0xff] %vm2988_vm7, %v2950_v48 }
 0x5f6   : > { %v3427_v56 = vpop.f32.mrb[18].mxu0 }
 0x5f7   : > { %v2965_v30 = vadd.f32 %v3427_v56, %v3218_v50  ;;  %v2959_v39 = vpop.f32.mrb[19].mxu0 }
 0x5f8   : > { %v2960_v46 = vadd.f32 %v3218_v50, %v2959_v39 }
 0x5f9   : > { %2992 = vst.msk [vmem:[%s270_s20 + $0x18] sm:$0xff] %vm2988_vm7, %v2965_v30 }
 0x5fa   : > { %2991 = vst.msk [vmem:[%s270_s20 + $0x10] sm:$0xff] %vm2988_vm7, %v2960_v46 }
 0x604   : > { %v3430_v36 = vpop.f32.mrb[20].mxu0 }
 0x605   : > { %v2975_v13 = vadd.f32 %v3430_v36, %v3218_v50  ;;  %v2969_v44 = vpop.f32.mrb[21].mxu0 }
 0x606   : > { %v2970_v45 = vadd.f32 %v3218_v50, %v2969_v44 }
 0x607   : > { %2994 = vst.msk [vmem:[%s270_s20 + $0x28] sm:$0xff] %vm2988_vm7, %v2975_v13 }
 0x608   : > { %2993 = vst.msk [vmem:[%s270_s20 + $0x20] sm:$0xff] %vm2988_vm7, %v2970_v45 }
 0x611   : > { %v3433_v2 = vpop.f32.mrb[22].mxu0 }
 0x612   : > { %v2985_v22 = vadd.f32 %v3433_v2, %v3218_v50  ;;  %v2979_v37 = vpop.f32.mrb[23].mxu0 }
 0x613   : > { %v2980_v10 = vadd.f32 %v3218_v50, %v2979_v37 }
 0x614   : > { %2996 = vst.msk [vmem:[%s270_s20 + $0x38] sm:$0xff] %vm2988_vm7, %v2985_v22 }
 0x615   : > { %2995 = vst.msk [vmem:[%s270_s20 + $0x30] sm:$0xff] %vm2988_vm7, %v2980_v10 }
 0x616 PF: > { %s15_s18 = sadd.s32 1, %s3687_s18  }
 0x617   : > { %p12_p4 = scmp.ge.s32.totalorder %s15_s18, 4  }
 0x619   :  { %14 = sbr.rel (!%p12_p4) target bundleno = 1 (0x1), region = 76 }

</bundles_post_ra>
